<compile_context>
chip_gen: v6e
topology: v6e:2x2x1
jax: 0.10.0
libtpu: 0.0.40
codegen_flags: <defaults>
</compile_context>

<pallas_src>
import functools
import math

import jax
import jax.numpy as jnp
from jax.experimental import pallas as pl
from jax.experimental.pallas import tpu as pltpu


# ----------------------------------------------------------------------------
# Fused kernel: Q/KV projection + per-head attention folded into the output
# projection + bias + residual + LayerNorm.  One (batch, q-tile) per grid step.
# ----------------------------------------------------------------------------
def _fused_attn_kernel(xq_ref, xkv_ref, wq_ref, bq_ref, wkv_ref, bkv_ref,
                       wo_ref, bo_ref, gamma_ref, beta_ref, out_ref,
                       *, num_heads, eps, approx_recip):
    x_q = xq_ref[0]                                   # (TQ, E) f32 (kept for residual)
    x_kv = xkv_ref[0]                                 # (S, E)  f32

    TQ, E = x_q.shape
    S = x_kv.shape[0]
    H = num_heads
    D = E // H

    # Projections: lane-dense outputs, bf16 MXU inputs, f32 accumulation.
    # 1/sqrt(D) is already folded into wq/bq by the wrapper.
    q = jnp.dot(x_q.astype(jnp.bfloat16), wq_ref[...],
                preferred_element_type=jnp.float32) + bq_ref[...]         # (TQ, E)
    kv = jnp.dot(x_kv.astype(jnp.bfloat16), wkv_ref[...],
                 preferred_element_type=jnp.float32) + bkv_ref[...]       # (S, 2E)

    # Per-head attention, accumulated straight into the output projection.
    # No head concat; only one head's intermediates are live at a time.
    attn = jnp.zeros((TQ, E), jnp.float32)
    for h in range(H):                                 # H is small & static
        qh = q[:, h * D:(h + 1) * D].astype(jnp.bfloat16)            # (TQ, D)
        kh = kv[:, h * D:(h + 1) * D].astype(jnp.bfloat16)           # (S, D)
        vh = kv[:, E + h * D:E + (h + 1) * D].astype(jnp.bfloat16)   # (S, D)

        # q_h @ k_h^T without materializing the transpose.
        scores = jax.lax.dot_general(
            qh, kh, (((1,), (1,)), ((), ())),
            preferred_element_type=jnp.float32)                       # (TQ, S) f32

        # Numerically stable softmax in f32.
        scores = scores - jnp.max(scores, axis=-1, keepdims=True)
        p = jnp.exp(scores)
        denom = jnp.sum(p, axis=-1, keepdims=True)
        if approx_recip:
            p = p * pl.reciprocal(denom, approx=True)   # EUP slot, ~free; ~1e-3 rel err
        else:
            p = p / denom

        ctx = jnp.dot(p.astype(jnp.bfloat16), vh,
                      preferred_element_type=jnp.float32)             # (TQ, D)
        attn = attn + jnp.dot(ctx.astype(jnp.bfloat16), wo_ref[h],
                              preferred_element_type=jnp.float32)     # (TQ, E)

    # Output bias + residual + LayerNorm (f32).  Dropout == identity (eval).
    z = x_q + attn + bo_ref[...]
    mean = jnp.mean(z, axis=-1, keepdims=True)
    d = z - mean
    var = jnp.mean(d * d, axis=-1, keepdims=True)
    out_ref[0] = (d * jax.lax.rsqrt(var + eps) * gamma_ref[...]
                  + beta_ref[...]).astype(out_ref.dtype)


def _pick_vmem_limit(need_bytes):
    """Shape-derived VMEM request with headroom, clamped to 3/4 physical."""
    try:
        physical = int(pltpu.get_tpu_info().vmem_capacity_bytes)
    except Exception:
        physical = 64 * 1024 * 1024          # v7x per-core size; conservative
    budget = (physical * 3) // 4             # headroom for Mosaic scratch / sems
    want = max(need_bytes * 2, 32 * 1024 * 1024)
    return int(max(min(want, budget), 8 * 1024 * 1024))


def _build_attention_call(*, B, S, E, H, TQ, NQ, eps, approx_recip,
                          single_buffer_weights, vmem_limit, cost):
    D = E // H

    def wspec(shape):
        ndim = len(shape)
        imap = lambda b, qi, _n=ndim: (0,) * _n
        if single_buffer_weights:
            # Constant index_map -> DMA'd once; don't waste a second buffer.
            return pl.BlockSpec(shape, imap, pipeline_mode=pl.Buffered(1))
        return pl.BlockSpec(shape, imap)

    kernel = functools.partial(_fused_attn_kernel, num_heads=H, eps=eps,
                               approx_recip=approx_recip)
    return pl.pallas_call(
        kernel,
        out_shape=jax.ShapeDtypeStruct((B, S, E), jnp.float32),
        grid=(B, NQ),
        in_specs=[
            pl.BlockSpec((1, TQ, E), lambda b, qi: (b, qi, 0)),   # x (q-tile rows; residual)
            pl.BlockSpec((1, S, E), lambda b, qi: (b, 0, 0)),     # x (full seq, for K/V)
            wspec((E, E)),          # Wq^T  (scale folded), bf16
            wspec((1, E)),          # bq    (scale folded), f32
            wspec((E, 2 * E)),      # Wkv^T, bf16
            wspec((1, 2 * E)),      # bkv,   f32
            wspec((H, D, E)),       # Wo^T packed per head, bf16
            wspec((1, E)),          # bo
            wspec((1, E)),          # gamma
            wspec((1, E)),          # beta
        ],
        out_specs=pl.BlockSpec((1, TQ, E), lambda b, qi: (b, qi, 0)),  # lane-dense (last dim E)
        compiler_params=pltpu.CompilerParams(
            dimension_semantics=("parallel", "parallel"),
            vmem_limit_bytes=vmem_limit),
        cost_estimate=cost,
    )


def self_attention_forward_bse(x_bse, params, *, num_heads, eps=1e-5,
                               approx_recip=True, max_q_tile=256):
    """Core entry point; x_bse: (B, S, E) float32.  Returns (B, S, E)."""
    B, S, E = x_bse.shape
    H = num_heads
    assert E % H == 0, "embed_dim must be divisible by num_heads"
    D = E // H
    scale = 1.0 / math.sqrt(D)

    # q-tiling: bounds the live (TQ, S) score block and gives v7x a 2nd parallel
    # grid axis.  TODO(synk): pad S to a multiple of 256 (v6e/v7x MXU) instead
    # of falling back to TQ = S when S is not tileable.
    if S > max_q_tile and S % max_q_tile == 0:
        TQ = max_q_tile
    else:
        TQ = S
    NQ = S // TQ

    # PyTorch-style (out, in) weights -> right-multiply form; fold 1/sqrt(D)
    # into the Q projection so the kernel never does a per-element scale.
    w_q = (params["wq"] * scale).T.astype(jnp.bfloat16)                       # (E, E)
    b_q = (params["bq"] * scale).reshape(1, E).astype(jnp.float32)
    w_kv = jnp.concatenate([params["wk"].T, params["wv"].T],
                           axis=1).astype(jnp.bfloat16)                       # (E, 2E)
    b_kv = jnp.concatenate([params["bk"], params["bv"]]
                           ).reshape(1, 2 * E).astype(jnp.float32)
    w_o = params["wo"].T.reshape(H, D, E).astype(jnp.bfloat16)                # (H, D, E)
    b_o = params["bo"].reshape(1, E).astype(jnp.float32)
    gamma = params["gamma"].reshape(1, E).astype(jnp.float32)
    beta = params["beta"].reshape(1, E).astype(jnp.float32)

    # VMEM need: double-buffered I/O blocks + weights + live intermediates.
    io_bytes = 2 * 4 * (TQ * E + S * E + TQ * E)
    weight_bytes = 2 * (E * E + E * 2 * E + H * D * E) + 4 * 7 * E
    live_bytes = 4 * (TQ * E + 2 * S * E + TQ * S + 2 * TQ * E)
    vmem_limit = _pick_vmem_limit(io_bytes + 2 * weight_bytes + live_bytes)

    # Cost estimate for the whole call (lets XLA schedule around the custom call).
    flops = (2 * B * S * E * E                 # Q projection
             + 2 * B * NQ * S * E * (2 * E)    # K/V projection (per q-tile)
             + 4 * B * S * S * E               # QK^T + P@V over all heads
             + 2 * B * S * E * E)              # output projection
    transcendentals = B * H * S * S            # softmax exp
    bytes_accessed = (4 * B * S * E * (2 + NQ) + weight_bytes)
    cost = pl.CostEstimate(flops=int(flops),
                           transcendentals=int(transcendentals),
                           bytes_accessed=int(bytes_accessed))

    args = (x_bse, x_bse, w_q, b_q, w_kv, b_kv, w_o, b_o, gamma, beta)
    common = dict(B=B, S=S, E=E, H=H, TQ=TQ, NQ=NQ, eps=eps,
                  approx_recip=approx_recip, vmem_limit=vmem_limit, cost=cost)
    try:
        call = _build_attention_call(single_buffer_weights=True, **common)
        return jax.block_until_ready(call(*args))
    except Exception:
        # pipeline_mode=pl.Buffered(1) not supported by this Pallas build;
        # fall back to default double buffering (identical semantics).
        call = _build_attention_call(single_buffer_weights=False, **common)
        return call(*args)


def self_attention_forward(x_sbe, params, *, num_heads, eps=1e-5,
                           approx_recip=True, max_q_tile=256):
    """PyTorch-layout entry point; x_sbe: (S, B, E).  Returns (S, B, E).

    TODO(synk): each (S,B,E)<->(B,S,E) transpose is an extra HBM pass; prefer
    the (B,S,E) contract (self_attention_forward_bse) when the caller allows.
    """
    x = jnp.transpose(x_sbe, (1, 0, 2))
    out = self_attention_forward_bse(x, params, num_heads=num_heads, eps=eps,
                                     approx_recip=approx_recip,
                                     max_q_tile=max_q_tile)
    return jnp.transpose(out, (1, 0, 2))


def _reference(x_sbe, params, *, num_heads):
    """Plain-JAX f32 reference mirroring nn.MultiheadAttention (eval) + residual + LN."""
    S, B, E = x_sbe.shape
    H, D = num_heads, E // num_heads
    x = jnp.transpose(x_sbe, (1, 0, 2))              # (B, S, E)
    q = x @ params["wq"].T + params["bq"]
    k = x @ params["wk"].T + params["bk"]
    v = x @ params["wv"].T + params["bv"]

    def split(t):                                    # (B,S,E)->(B,H,S,D)
        return jnp.transpose(t.reshape(B, S, H, D), (0, 2, 1, 3))

    qh, kh, vh = split(q), split(k), split(v)
    scores = jnp.einsum("bhsd,bhtd->bhst", qh / jnp.sqrt(D), kh)
    p = jax.nn.softmax(scores, axis=-1)
    ctx = jnp.einsum("bhst,bhtd->bhsd", p, vh)
    ctx = jnp.transpose(ctx, (0, 2, 1, 3)).reshape(B, S, E)
    attn_out = ctx @ params["wo"].T + params["bo"]
    z = x + attn_out
    mean = jnp.mean(z, axis=-1, keepdims=True)
    var = jnp.mean((z - mean) ** 2, axis=-1, keepdims=True)
    ln = (z - mean) / jnp.sqrt(var + 1e-5) * params["gamma"] + params["beta"]
    return jnp.transpose(ln, (1, 0, 2))


if __name__ == "__main__":
    S, B, E, H = 8, 2, 32, 4

    key = jax.random.PRNGKey(0)
    ks = jax.random.split(key, 10)
    init = lambda k, shape, s=0.1: (s * jax.random.normal(k, shape)).astype(jnp.float32)

    params = {
        "wq": init(ks[0], (E, E)),
        "wk": init(ks[1], (E, E)),
        "wv": init(ks[2], (E, E)),
        "bq": init(ks[3], (E,)),
        "bk": init(ks[4], (E,)),
        "bv": init(ks[5], (E,)),
        "wo": init(ks[6], (E, E)),
        "bo": init(ks[7], (E,)),
        "gamma": jnp.ones((E,), jnp.float32),
        "beta": jnp.zeros((E,), jnp.float32),
    }

    x = jax.random.normal(ks[8], (S, B, E), dtype=jnp.float32)

    out = self_attention_forward(x, params, num_heads=H)
    out = jax.block_until_ready(out)

    ref = _reference(x, params, num_heads=H)
    assert out.shape == (S, B, E)
    # Tolerance widened vs. the pure-f32 reference: the kernel runs its matmuls
    # in bf16 (MXU-native, f32 accumulation) and uses the EUP approx reciprocal
    # in the softmax denominator (pass approx_recip=False for tighter parity).
    assert jnp.allclose(out, ref, rtol=2e-2, atol=2e-2), "mismatch vs JAX reference"

    print("KERNEL_OK")
</pallas_src>

<mosaic_0001>
module attributes {stable_mosaic.version = 11 : i64} {
  func.func @_fused_attn_kernel(%arg0: i32, %arg1: i32, %arg2: memref<1x8x32xf32, #tpu.memory_space<vmem>>, %arg3: memref<1x8x32xf32, #tpu.memory_space<vmem>>, %arg4: memref<32x32xbf16, #tpu.memory_space<vmem>>, %arg5: memref<1x32xf32, #tpu.memory_space<vmem>>, %arg6: memref<32x64xbf16, #tpu.memory_space<vmem>>, %arg7: memref<1x64xf32, #tpu.memory_space<vmem>>, %arg8: memref<4x8x32xbf16, #tpu.memory_space<vmem>>, %arg9: memref<1x32xf32, #tpu.memory_space<vmem>>, %arg10: memref<1x32xf32, #tpu.memory_space<vmem>>, %arg11: memref<1x32xf32, #tpu.memory_space<vmem>>, %arg12: memref<1x8x32xf32, #tpu.memory_space<vmem>>) attributes {dimension_semantics = [#tpu.dimension_semantics<parallel>, #tpu.dimension_semantics<parallel>], iteration_bounds = array<i64: 2, 1>, scalar_prefetch = 0 : i64, scratch_operands = 0 : i64, tpu.core_type = #tpu.core_type<tc>, window_params = [{transform_indices = @transform_0, window_bounds = array<i64: 1, 8, 32>}, {transform_indices = @transform_1, window_bounds = array<i64: 1, 8, 32>}, {pipeline_mode = #tpu.pipeline_mode<synchronous>, transform_indices = @transform_2, window_bounds = array<i64: 32, 32>}, {pipeline_mode = #tpu.pipeline_mode<synchronous>, transform_indices = @transform_3, window_bounds = array<i64: 1, 32>}, {pipeline_mode = #tpu.pipeline_mode<synchronous>, transform_indices = @transform_4, window_bounds = array<i64: 32, 64>}, {pipeline_mode = #tpu.pipeline_mode<synchronous>, transform_indices = @transform_5, window_bounds = array<i64: 1, 64>}, {pipeline_mode = #tpu.pipeline_mode<synchronous>, transform_indices = @transform_6, window_bounds = array<i64: 4, 8, 32>}, {pipeline_mode = #tpu.pipeline_mode<synchronous>, transform_indices = @transform_7, window_bounds = array<i64: 1, 32>}, {pipeline_mode = #tpu.pipeline_mode<synchronous>, transform_indices = @transform_8, window_bounds = array<i64: 1, 32>}, {pipeline_mode = #tpu.pipeline_mode<synchronous>, transform_indices = @transform_9, window_bounds = array<i64: 1, 32>}, {transform_indices = @transform_10, window_bounds = array<i64: 1, 8, 32>}]} {
    %c0 = arith.constant 0 : index
    %c0_0 = arith.constant 0 : index
    %c0_1 = arith.constant 0 : index
    %0 = vector.load %arg2[%c0, %c0_0, %c0_1] : memref<1x8x32xf32, #tpu.memory_space<vmem>>, vector<1x8x32xf32>
    %1 = vector.shape_cast %0 : vector<1x8x32xf32> to vector<8x32xf32>
    %c0_2 = arith.constant 0 : index
    %c0_3 = arith.constant 0 : index
    %c0_4 = arith.constant 0 : index
    %2 = vector.load %arg3[%c0_2, %c0_3, %c0_4] : memref<1x8x32xf32, #tpu.memory_space<vmem>>, vector<1x8x32xf32>
    %3 = vector.shape_cast %2 : vector<1x8x32xf32> to vector<8x32xf32>
    %4 = arith.truncf %1 : vector<8x32xf32> to vector<8x32xbf16>
    %c0_5 = arith.constant 0 : index
    %c0_6 = arith.constant 0 : index
    %5 = vector.load %arg4[%c0_5, %c0_6] : memref<32x32xbf16, #tpu.memory_space<vmem>>, vector<32x32xbf16>
    %cst = arith.constant dense<0.000000e+00> : vector<8x32xf32>
    %6 = tpu.matmul %4, %5, %cst {dimension_numbers = #tpu.dot_dimension_numbers<[1], [0], [0], [1], [0, 0, 1, 1], [], []>} : vector<8x32xbf16>, vector<32x32xbf16>, vector<8x32xf32> -> vector<8x32xf32>
    %c0_7 = arith.constant 0 : index
    %c0_8 = arith.constant 0 : index
    %7 = vector.load %arg5[%c0_7, %c0_8] : memref<1x32xf32, #tpu.memory_space<vmem>>, vector<1x32xf32>
    %8 = vector.broadcast %7 : vector<1x32xf32> to vector<8x32xf32>
    %9 = arith.addf %6, %8 : vector<8x32xf32>
    %10 = arith.truncf %3 : vector<8x32xf32> to vector<8x32xbf16>
    %c0_9 = arith.constant 0 : index
    %c0_10 = arith.constant 0 : index
    %11 = vector.load %arg6[%c0_9, %c0_10] : memref<32x64xbf16, #tpu.memory_space<vmem>>, vector<32x64xbf16>
    %cst_11 = arith.constant dense<0.000000e+00> : vector<8x64xf32>
    %12 = tpu.matmul %10, %11, %cst_11 {dimension_numbers = #tpu.dot_dimension_numbers<[1], [0], [0], [1], [0, 0, 1, 1], [], []>} : vector<8x32xbf16>, vector<32x64xbf16>, vector<8x64xf32> -> vector<8x64xf32>
    %c0_12 = arith.constant 0 : index
    %c0_13 = arith.constant 0 : index
    %13 = vector.load %arg7[%c0_12, %c0_13] : memref<1x64xf32, #tpu.memory_space<vmem>>, vector<1x64xf32>
    %14 = vector.broadcast %13 : vector<1x64xf32> to vector<8x64xf32>
    %15 = arith.addf %12, %14 : vector<8x64xf32>
    %cst_14 = arith.constant 0.000000e+00 : f32
    %16 = vector.broadcast %cst_14 : f32 to vector<8x32xf32>
    %17 = vector.extract_strided_slice %9 {offsets = [0, 0], sizes = [8, 8], strides = [1, 1]} : vector<8x32xf32> to vector<8x8xf32>
    %18 = arith.truncf %17 : vector<8x8xf32> to vector<8x8xbf16>
    %19 = vector.extract_strided_slice %15 {offsets = [0, 0], sizes = [8, 8], strides = [1, 1]} : vector<8x64xf32> to vector<8x8xf32>
    %20 = arith.truncf %19 : vector<8x8xf32> to vector<8x8xbf16>
    %21 = vector.extract_strided_slice %15 {offsets = [0, 32], sizes = [8, 8], strides = [1, 1]} : vector<8x64xf32> to vector<8x8xf32>
    %22 = arith.truncf %21 : vector<8x8xf32> to vector<8x8xbf16>
    %cst_15 = arith.constant dense<0.000000e+00> : vector<8x8xf32>
    %23 = tpu.matmul %18, %20, %cst_15 {dimension_numbers = #tpu.dot_dimension_numbers<[1], [1], [0], [0], [0, 0, 1, 0], [], []>} : vector<8x8xbf16>, vector<8x8xbf16>, vector<8x8xf32> -> vector<8x8xf32>
    %cst_16 = arith.constant dense<0xFF800000> : vector<8xf32>
    %24 = vector.multi_reduction <maximumf>, %23, %cst_16 [1] : vector<8x8xf32> to vector<8xf32>
    %25 = vector.shape_cast %24 : vector<8xf32> to vector<8x1xf32>
    %26 = vector.broadcast %25 : vector<8x1xf32> to vector<8x8xf32>
    %27 = arith.subf %23, %26 : vector<8x8xf32>
    %28 = math.exp %27 : vector<8x8xf32>
    %cst_17 = arith.constant dense<0.000000e+00> : vector<8xf32>
    %29 = vector.multi_reduction <add>, %28, %cst_17 [1] : vector<8x8xf32> to vector<8xf32>
    %30 = vector.shape_cast %29 : vector<8xf32> to vector<8x1xf32>
    %31 = tpu.reciprocal %30 {approx = true} : vector<8x1xf32> -> vector<8x1xf32>
    %32 = vector.broadcast %31 : vector<8x1xf32> to vector<8x8xf32>
    %33 = arith.mulf %28, %32 : vector<8x8xf32>
    %34 = arith.truncf %33 : vector<8x8xf32> to vector<8x8xbf16>
    %cst_18 = arith.constant dense<0.000000e+00> : vector<8x8xf32>
    %35 = tpu.matmul %34, %22, %cst_18 {dimension_numbers = #tpu.dot_dimension_numbers<[1], [0], [0], [1], [0, 0, 1, 1], [], []>} : vector<8x8xbf16>, vector<8x8xbf16>, vector<8x8xf32> -> vector<8x8xf32>
    %36 = arith.truncf %35 : vector<8x8xf32> to vector<8x8xbf16>
    %c0_19 = arith.constant 0 : index
    %c0_20 = arith.constant 0 : index
    %c0_21 = arith.constant 0 : index
    %37 = vector.load %arg8[%c0_19, %c0_20, %c0_21] : memref<4x8x32xbf16, #tpu.memory_space<vmem>>, vector<1x8x32xbf16>
    %38 = vector.shape_cast %37 : vector<1x8x32xbf16> to vector<8x32xbf16>
    %cst_22 = arith.constant dense<0.000000e+00> : vector<8x32xf32>
    %39 = tpu.matmul %36, %38, %cst_22 {dimension_numbers = #tpu.dot_dimension_numbers<[1], [0], [0], [1], [0, 0, 1, 1], [], []>} : vector<8x8xbf16>, vector<8x32xbf16>, vector<8x32xf32> -> vector<8x32xf32>
    %40 = arith.addf %16, %39 : vector<8x32xf32>
    %41 = vector.extract_strided_slice %9 {offsets = [0, 8], sizes = [8, 8], strides = [1, 1]} : vector<8x32xf32> to vector<8x8xf32>
    %42 = arith.truncf %41 : vector<8x8xf32> to vector<8x8xbf16>
    %43 = vector.extract_strided_slice %15 {offsets = [0, 8], sizes = [8, 8], strides = [1, 1]} : vector<8x64xf32> to vector<8x8xf32>
    %44 = arith.truncf %43 : vector<8x8xf32> to vector<8x8xbf16>
    %45 = vector.extract_strided_slice %15 {offsets = [0, 40], sizes = [8, 8], strides = [1, 1]} : vector<8x64xf32> to vector<8x8xf32>
    %46 = arith.truncf %45 : vector<8x8xf32> to vector<8x8xbf16>
    %cst_23 = arith.constant dense<0.000000e+00> : vector<8x8xf32>
    %47 = tpu.matmul %42, %44, %cst_23 {dimension_numbers = #tpu.dot_dimension_numbers<[1], [1], [0], [0], [0, 0, 1, 0], [], []>} : vector<8x8xbf16>, vector<8x8xbf16>, vector<8x8xf32> -> vector<8x8xf32>
    %cst_24 = arith.constant dense<0xFF800000> : vector<8xf32>
    %48 = vector.multi_reduction <maximumf>, %47, %cst_24 [1] : vector<8x8xf32> to vector<8xf32>
    %49 = vector.shape_cast %48 : vector<8xf32> to vector<8x1xf32>
    %50 = vector.broadcast %49 : vector<8x1xf32> to vector<8x8xf32>
    %51 = arith.subf %47, %50 : vector<8x8xf32>
    %52 = math.exp %51 : vector<8x8xf32>
    %cst_25 = arith.constant dense<0.000000e+00> : vector<8xf32>
    %53 = vector.multi_reduction <add>, %52, %cst_25 [1] : vector<8x8xf32> to vector<8xf32>
    %54 = vector.shape_cast %53 : vector<8xf32> to vector<8x1xf32>
    %55 = tpu.reciprocal %54 {approx = true} : vector<8x1xf32> -> vector<8x1xf32>
    %56 = vector.broadcast %55 : vector<8x1xf32> to vector<8x8xf32>
    %57 = arith.mulf %52, %56 : vector<8x8xf32>
    %58 = arith.truncf %57 : vector<8x8xf32> to vector<8x8xbf16>
    %cst_26 = arith.constant dense<0.000000e+00> : vector<8x8xf32>
    %59 = tpu.matmul %58, %46, %cst_26 {dimension_numbers = #tpu.dot_dimension_numbers<[1], [0], [0], [1], [0, 0, 1, 1], [], []>} : vector<8x8xbf16>, vector<8x8xbf16>, vector<8x8xf32> -> vector<8x8xf32>
    %60 = arith.truncf %59 : vector<8x8xf32> to vector<8x8xbf16>
    %c1 = arith.constant 1 : index
    %c0_27 = arith.constant 0 : index
    %c0_28 = arith.constant 0 : index
    %61 = vector.load %arg8[%c1, %c0_27, %c0_28] : memref<4x8x32xbf16, #tpu.memory_space<vmem>>, vector<1x8x32xbf16>
    %62 = vector.shape_cast %61 : vector<1x8x32xbf16> to vector<8x32xbf16>
    %cst_29 = arith.constant dense<0.000000e+00> : vector<8x32xf32>
    %63 = tpu.matmul %60, %62, %cst_29 {dimension_numbers = #tpu.dot_dimension_numbers<[1], [0], [0], [1], [0, 0, 1, 1], [], []>} : vector<8x8xbf16>, vector<8x32xbf16>, vector<8x32xf32> -> vector<8x32xf32>
    %64 = arith.addf %40, %63 : vector<8x32xf32>
    %65 = vector.extract_strided_slice %9 {offsets = [0, 16], sizes = [8, 8], strides = [1, 1]} : vector<8x32xf32> to vector<8x8xf32>
    %66 = arith.truncf %65 : vector<8x8xf32> to vector<8x8xbf16>
    %67 = vector.extract_strided_slice %15 {offsets = [0, 16], sizes = [8, 8], strides = [1, 1]} : vector<8x64xf32> to vector<8x8xf32>
    %68 = arith.truncf %67 : vector<8x8xf32> to vector<8x8xbf16>
    %69 = vector.extract_strided_slice %15 {offsets = [0, 48], sizes = [8, 8], strides = [1, 1]} : vector<8x64xf32> to vector<8x8xf32>
    %70 = arith.truncf %69 : vector<8x8xf32> to vector<8x8xbf16>
    %cst_30 = arith.constant dense<0.000000e+00> : vector<8x8xf32>
    %71 = tpu.matmul %66, %68, %cst_30 {dimension_numbers = #tpu.dot_dimension_numbers<[1], [1], [0], [0], [0, 0, 1, 0], [], []>} : vector<8x8xbf16>, vector<8x8xbf16>, vector<8x8xf32> -> vector<8x8xf32>
    %cst_31 = arith.constant dense<0xFF800000> : vector<8xf32>
    %72 = vector.multi_reduction <maximumf>, %71, %cst_31 [1] : vector<8x8xf32> to vector<8xf32>
    %73 = vector.shape_cast %72 : vector<8xf32> to vector<8x1xf32>
    %74 = vector.broadcast %73 : vector<8x1xf32> to vector<8x8xf32>
    %75 = arith.subf %71, %74 : vector<8x8xf32>
    %76 = math.exp %75 : vector<8x8xf32>
    %cst_32 = arith.constant dense<0.000000e+00> : vector<8xf32>
    %77 = vector.multi_reduction <add>, %76, %cst_32 [1] : vector<8x8xf32> to vector<8xf32>
    %78 = vector.shape_cast %77 : vector<8xf32> to vector<8x1xf32>
    %79 = tpu.reciprocal %78 {approx = true} : vector<8x1xf32> -> vector<8x1xf32>
    %80 = vector.broadcast %79 : vector<8x1xf32> to vector<8x8xf32>
    %81 = arith.mulf %76, %80 : vector<8x8xf32>
    %82 = arith.truncf %81 : vector<8x8xf32> to vector<8x8xbf16>
    %cst_33 = arith.constant dense<0.000000e+00> : vector<8x8xf32>
    %83 = tpu.matmul %82, %70, %cst_33 {dimension_numbers = #tpu.dot_dimension_numbers<[1], [0], [0], [1], [0, 0, 1, 1], [], []>} : vector<8x8xbf16>, vector<8x8xbf16>, vector<8x8xf32> -> vector<8x8xf32>
    %84 = arith.truncf %83 : vector<8x8xf32> to vector<8x8xbf16>
    %c2 = arith.constant 2 : index
    %c0_34 = arith.constant 0 : index
    %c0_35 = arith.constant 0 : index
    %85 = vector.load %arg8[%c2, %c0_34, %c0_35] : memref<4x8x32xbf16, #tpu.memory_space<vmem>>, vector<1x8x32xbf16>
    %86 = vector.shape_cast %85 : vector<1x8x32xbf16> to vector<8x32xbf16>
    %cst_36 = arith.constant dense<0.000000e+00> : vector<8x32xf32>
    %87 = tpu.matmul %84, %86, %cst_36 {dimension_numbers = #tpu.dot_dimension_numbers<[1], [0], [0], [1], [0, 0, 1, 1], [], []>} : vector<8x8xbf16>, vector<8x32xbf16>, vector<8x32xf32> -> vector<8x32xf32>
    %88 = arith.addf %64, %87 : vector<8x32xf32>
    %89 = vector.extract_strided_slice %9 {offsets = [0, 24], sizes = [8, 8], strides = [1, 1]} : vector<8x32xf32> to vector<8x8xf32>
    %90 = arith.truncf %89 : vector<8x8xf32> to vector<8x8xbf16>
    %91 = vector.extract_strided_slice %15 {offsets = [0, 24], sizes = [8, 8], strides = [1, 1]} : vector<8x64xf32> to vector<8x8xf32>
    %92 = arith.truncf %91 : vector<8x8xf32> to vector<8x8xbf16>
    %93 = vector.extract_strided_slice %15 {offsets = [0, 56], sizes = [8, 8], strides = [1, 1]} : vector<8x64xf32> to vector<8x8xf32>
    %94 = arith.truncf %93 : vector<8x8xf32> to vector<8x8xbf16>
    %cst_37 = arith.constant dense<0.000000e+00> : vector<8x8xf32>
    %95 = tpu.matmul %90, %92, %cst_37 {dimension_numbers = #tpu.dot_dimension_numbers<[1], [1], [0], [0], [0, 0, 1, 0], [], []>} : vector<8x8xbf16>, vector<8x8xbf16>, vector<8x8xf32> -> vector<8x8xf32>
    %cst_38 = arith.constant dense<0xFF800000> : vector<8xf32>
    %96 = vector.multi_reduction <maximumf>, %95, %cst_38 [1] : vector<8x8xf32> to vector<8xf32>
    %97 = vector.shape_cast %96 : vector<8xf32> to vector<8x1xf32>
    %98 = vector.broadcast %97 : vector<8x1xf32> to vector<8x8xf32>
    %99 = arith.subf %95, %98 : vector<8x8xf32>
    %100 = math.exp %99 : vector<8x8xf32>
    %cst_39 = arith.constant dense<0.000000e+00> : vector<8xf32>
    %101 = vector.multi_reduction <add>, %100, %cst_39 [1] : vector<8x8xf32> to vector<8xf32>
    %102 = vector.shape_cast %101 : vector<8xf32> to vector<8x1xf32>
    %103 = tpu.reciprocal %102 {approx = true} : vector<8x1xf32> -> vector<8x1xf32>
    %104 = vector.broadcast %103 : vector<8x1xf32> to vector<8x8xf32>
    %105 = arith.mulf %100, %104 : vector<8x8xf32>
    %106 = arith.truncf %105 : vector<8x8xf32> to vector<8x8xbf16>
    %cst_40 = arith.constant dense<0.000000e+00> : vector<8x8xf32>
    %107 = tpu.matmul %106, %94, %cst_40 {dimension_numbers = #tpu.dot_dimension_numbers<[1], [0], [0], [1], [0, 0, 1, 1], [], []>} : vector<8x8xbf16>, vector<8x8xbf16>, vector<8x8xf32> -> vector<8x8xf32>
    %108 = arith.truncf %107 : vector<8x8xf32> to vector<8x8xbf16>
    %c3 = arith.constant 3 : index
    %c0_41 = arith.constant 0 : index
    %c0_42 = arith.constant 0 : index
    %109 = vector.load %arg8[%c3, %c0_41, %c0_42] : memref<4x8x32xbf16, #tpu.memory_space<vmem>>, vector<1x8x32xbf16>
    %110 = vector.shape_cast %109 : vector<1x8x32xbf16> to vector<8x32xbf16>
    %cst_43 = arith.constant dense<0.000000e+00> : vector<8x32xf32>
    %111 = tpu.matmul %108, %110, %cst_43 {dimension_numbers = #tpu.dot_dimension_numbers<[1], [0], [0], [1], [0, 0, 1, 1], [], []>} : vector<8x8xbf16>, vector<8x32xbf16>, vector<8x32xf32> -> vector<8x32xf32>
    %112 = arith.addf %88, %111 : vector<8x32xf32>
    %113 = arith.addf %1, %112 : vector<8x32xf32>
    %c0_44 = arith.constant 0 : index
    %c0_45 = arith.constant 0 : index
    %114 = vector.load %arg9[%c0_44, %c0_45] : memref<1x32xf32, #tpu.memory_space<vmem>>, vector<1x32xf32>
    %115 = vector.broadcast %114 : vector<1x32xf32> to vector<8x32xf32>
    %116 = arith.addf %113, %115 : vector<8x32xf32>
    %cst_46 = arith.constant dense<0.000000e+00> : vector<8xf32>
    %117 = vector.multi_reduction <add>, %116, %cst_46 [1] : vector<8x32xf32> to vector<8xf32>
    %118 = vector.shape_cast %117 : vector<8xf32> to vector<8x1xf32>
    %cst_47 = arith.constant 3.200000e+01 : f32
    %119 = vector.broadcast %cst_47 : f32 to vector<8x1xf32>
    %120 = arith.divf %118, %119 : vector<8x1xf32>
    %121 = vector.broadcast %120 : vector<8x1xf32> to vector<8x32xf32>
    %122 = arith.subf %116, %121 : vector<8x32xf32>
    %123 = arith.mulf %122, %122 : vector<8x32xf32>
    %cst_48 = arith.constant dense<0.000000e+00> : vector<8xf32>
    %124 = vector.multi_reduction <add>, %123, %cst_48 [1] : vector<8x32xf32> to vector<8xf32>
    %125 = vector.shape_cast %124 : vector<8xf32> to vector<8x1xf32>
    %cst_49 = arith.constant 3.200000e+01 : f32
    %126 = vector.broadcast %cst_49 : f32 to vector<8x1xf32>
    %127 = arith.divf %125, %126 : vector<8x1xf32>
    %cst_50 = arith.constant 9.99999974E-6 : f32
    %128 = vector.broadcast %cst_50 : f32 to vector<8x1xf32>
    %129 = arith.addf %127, %128 : vector<8x1xf32>
    %130 = math.rsqrt %129 : vector<8x1xf32>
    %131 = vector.broadcast %130 : vector<8x1xf32> to vector<8x32xf32>
    %132 = arith.mulf %122, %131 : vector<8x32xf32>
    %c0_51 = arith.constant 0 : index
    %c0_52 = arith.constant 0 : index
    %133 = vector.load %arg10[%c0_51, %c0_52] : memref<1x32xf32, #tpu.memory_space<vmem>>, vector<1x32xf32>
    %134 = vector.broadcast %133 : vector<1x32xf32> to vector<8x32xf32>
    %135 = arith.mulf %132, %134 : vector<8x32xf32>
    %c0_53 = arith.constant 0 : index
    %c0_54 = arith.constant 0 : index
    %136 = vector.load %arg11[%c0_53, %c0_54] : memref<1x32xf32, #tpu.memory_space<vmem>>, vector<1x32xf32>
    %137 = vector.broadcast %136 : vector<1x32xf32> to vector<8x32xf32>
    %138 = arith.addf %135, %137 : vector<8x32xf32>
    %c0_55 = arith.constant 0 : index
    %c0_56 = arith.constant 0 : index
    %c0_57 = arith.constant 0 : index
    %139 = vector.load %arg12[%c0_55, %c0_56, %c0_57] : memref<1x8x32xf32, #tpu.memory_space<vmem>>, vector<1x8x32xf32>
    %140 = vector.shape_cast %139 : vector<1x8x32xf32> to vector<8x32xf32>
    %141 = vector.shape_cast %138 : vector<8x32xf32> to vector<1x8x32xf32>
    tpu.vector_store %arg12[%c0_55, %c0_56, %c0_57], %141 {strides = array<i32>} : memref<1x8x32xf32, #tpu.memory_space<vmem>>, vector<1x8x32xf32>,
    return
  }
  func.func @transform_0(%arg0: i32, %arg1: i32) -> (i32, i32, i32) {
    %c0_i32 = arith.constant 0 : i32
    %c0_i32_0 = arith.constant 0 : i32
    return %arg0, %arg1, %c0_i32 : i32, i32, i32
  }
  func.func @transform_1(%arg0: i32, %arg1: i32) -> (i32, i32, i32) {
    %c0_i32 = arith.constant 0 : i32
    %c0_i32_0 = arith.constant 0 : i32
    %c0_i32_1 = arith.constant 0 : i32
    return %arg0, %c0_i32, %c0_i32_0 : i32, i32, i32
  }
  func.func @transform_2(%arg0: i32, %arg1: i32) -> (i32, i32) {
    %c0_i32 = arith.constant 0 : i32
    %c0_i32_0 = arith.constant 0 : i32
    %c0_i32_1 = arith.constant 0 : i32
    return %c0_i32, %c0_i32_0 : i32, i32
  }
  func.func @transform_3(%arg0: i32, %arg1: i32) -> (i32, i32) {
    %c0_i32 = arith.constant 0 : i32
    %c0_i32_0 = arith.constant 0 : i32
    %c0_i32_1 = arith.constant 0 : i32
    return %c0_i32, %c0_i32_0 : i32, i32
  }
  func.func @transform_4(%arg0: i32, %arg1: i32) -> (i32, i32) {
    %c0_i32 = arith.constant 0 : i32
    %c0_i32_0 = arith.constant 0 : i32
    %c0_i32_1 = arith.constant 0 : i32
    return %c0_i32, %c0_i32_0 : i32, i32
  }
  func.func @transform_5(%arg0: i32, %arg1: i32) -> (i32, i32) {
    %c0_i32 = arith.constant 0 : i32
    %c0_i32_0 = arith.constant 0 : i32
    %c0_i32_1 = arith.constant 0 : i32
    return %c0_i32, %c0_i32_0 : i32, i32
  }
  func.func @transform_6(%arg0: i32, %arg1: i32) -> (i32, i32, i32) {
    %c0_i32 = arith.constant 0 : i32
    %c0_i32_0 = arith.constant 0 : i32
    %c0_i32_1 = arith.constant 0 : i32
    %c0_i32_2 = arith.constant 0 : i32
    return %c0_i32, %c0_i32_0, %c0_i32_1 : i32, i32, i32
  }
  func.func @transform_7(%arg0: i32, %arg1: i32) -> (i32, i32) {
    %c0_i32 = arith.constant 0 : i32
    %c0_i32_0 = arith.constant 0 : i32
    %c0_i32_1 = arith.constant 0 : i32
    return %c0_i32, %c0_i32_0 : i32, i32
  }
  func.func @transform_8(%arg0: i32, %arg1: i32) -> (i32, i32) {
    %c0_i32 = arith.constant 0 : i32
    %c0_i32_0 = arith.constant 0 : i32
    %c0_i32_1 = arith.constant 0 : i32
    return %c0_i32, %c0_i32_0 : i32, i32
  }
  func.func @transform_9(%arg0: i32, %arg1: i32) -> (i32, i32) {
    %c0_i32 = arith.constant 0 : i32
    %c0_i32_0 = arith.constant 0 : i32
    %c0_i32_1 = arith.constant 0 : i32
    return %c0_i32, %c0_i32_0 : i32, i32
  }
  func.func @transform_10(%arg0: i32, %arg1: i32) -> (i32, i32, i32) {
    %c0_i32 = arith.constant 0 : i32
    %c0_i32_0 = arith.constant 0 : i32
    return %arg0, %arg1, %c0_i32 : i32, i32, i32
  }
}

module attributes {stable_mosaic.version = 11 : i64} {
  func.func @_fused_attn_kernel(%arg0: i32, %arg1: i32, %arg2: memref<1x8x32xf32, #tpu.memory_space<vmem>>, %arg3: memref<1x8x32xf32, #tpu.memory_space<vmem>>, %arg4: memref<32x32xbf16, #tpu.memory_space<vmem>>, %arg5: memref<1x32xf32, #tpu.memory_space<vmem>>, %arg6: memref<32x64xbf16, #tpu.memory_space<vmem>>, %arg7: memref<1x64xf32, #tpu.memory_space<vmem>>, %arg8: memref<4x8x32xbf16, #tpu.memory_space<vmem>>, %arg9: memref<1x32xf32, #tpu.memory_space<vmem>>, %arg10: memref<1x32xf32, #tpu.memory_space<vmem>>, %arg11: memref<1x32xf32, #tpu.memory_space<vmem>>, %arg12: memref<1x8x32xf32, #tpu.memory_space<vmem>>) attributes {dimension_semantics = [#tpu.dimension_semantics<parallel>, #tpu.dimension_semantics<parallel>], iteration_bounds = array<i64: 2, 1>, scalar_prefetch = 0 : i64, scratch_operands = 0 : i64, tpu.core_type = #tpu.core_type<tc>, window_params = [{transform_indices = @transform_0, window_bounds = array<i64: 1, 8, 32>}, {transform_indices = @transform_1, window_bounds = array<i64: 1, 8, 32>}, {pipeline_mode = #tpu.pipeline_mode<synchronous>, transform_indices = @transform_2, window_bounds = array<i64: 32, 32>}, {pipeline_mode = #tpu.pipeline_mode<synchronous>, transform_indices = @transform_3, window_bounds = array<i64: 1, 32>}, {pipeline_mode = #tpu.pipeline_mode<synchronous>, transform_indices = @transform_4, window_bounds = array<i64: 32, 64>}, {pipeline_mode = #tpu.pipeline_mode<synchronous>, transform_indices = @transform_5, window_bounds = array<i64: 1, 64>}, {pipeline_mode = #tpu.pipeline_mode<synchronous>, transform_indices = @transform_6, window_bounds = array<i64: 4, 8, 32>}, {pipeline_mode = #tpu.pipeline_mode<synchronous>, transform_indices = @transform_7, window_bounds = array<i64: 1, 32>}, {pipeline_mode = #tpu.pipeline_mode<synchronous>, transform_indices = @transform_8, window_bounds = array<i64: 1, 32>}, {pipeline_mode = #tpu.pipeline_mode<synchronous>, transform_indices = @transform_9, window_bounds = array<i64: 1, 32>}, {transform_indices = @transform_10, window_bounds = array<i64: 1, 8, 32>}]} {
    %c0 = arith.constant 0 : index
    %c0_0 = arith.constant 0 : index
    %c0_1 = arith.constant 0 : index
    %0 = vector.load %arg2[%c0, %c0_0, %c0_1] : memref<1x8x32xf32, #tpu.memory_space<vmem>>, vector<1x8x32xf32>
    %1 = vector.shape_cast %0 : vector<1x8x32xf32> to vector<8x32xf32>
    %c0_2 = arith.constant 0 : index
    %c0_3 = arith.constant 0 : index
    %c0_4 = arith.constant 0 : index
    %2 = vector.load %arg3[%c0_2, %c0_3, %c0_4] : memref<1x8x32xf32, #tpu.memory_space<vmem>>, vector<1x8x32xf32>
    %3 = vector.shape_cast %2 : vector<1x8x32xf32> to vector<8x32xf32>
    %4 = arith.truncf %1 : vector<8x32xf32> to vector<8x32xbf16>
    %c0_5 = arith.constant 0 : index
    %c0_6 = arith.constant 0 : index
    %5 = vector.load %arg4[%c0_5, %c0_6] : memref<32x32xbf16, #tpu.memory_space<vmem>>, vector<32x32xbf16>
    %cst = arith.constant dense<0.000000e+00> : vector<8x32xf32>
    %6 = tpu.matmul %4, %5, %cst {dimension_numbers = #tpu.dot_dimension_numbers<[1], [0], [0], [1], [0, 0, 1, 1], [], []>} : vector<8x32xbf16>, vector<32x32xbf16>, vector<8x32xf32> -> vector<8x32xf32>
    %c0_7 = arith.constant 0 : index
    %c0_8 = arith.constant 0 : index
    %7 = vector.load %arg5[%c0_7, %c0_8] : memref<1x32xf32, #tpu.memory_space<vmem>>, vector<1x32xf32>
    %8 = vector.broadcast %7 : vector<1x32xf32> to vector<8x32xf32>
    %9 = arith.addf %6, %8 : vector<8x32xf32>
    %10 = arith.truncf %3 : vector<8x32xf32> to vector<8x32xbf16>
    %c0_9 = arith.constant 0 : index
    %c0_10 = arith.constant 0 : index
    %11 = vector.load %arg6[%c0_9, %c0_10] : memref<32x64xbf16, #tpu.memory_space<vmem>>, vector<32x64xbf16>
    %cst_11 = arith.constant dense<0.000000e+00> : vector<8x64xf32>
    %12 = tpu.matmul %10, %11, %cst_11 {dimension_numbers = #tpu.dot_dimension_numbers<[1], [0], [0], [1], [0, 0, 1, 1], [], []>} : vector<8x32xbf16>, vector<32x64xbf16>, vector<8x64xf32> -> vector<8x64xf32>
    %c0_12 = arith.constant 0 : index
    %c0_13 = arith.constant 0 : index
    %13 = vector.load %arg7[%c0_12, %c0_13] : memref<1x64xf32, #tpu.memory_space<vmem>>, vector<1x64xf32>
    %14 = vector.broadcast %13 : vector<1x64xf32> to vector<8x64xf32>
    %15 = arith.addf %12, %14 : vector<8x64xf32>
    %cst_14 = arith.constant 0.000000e+00 : f32
    %16 = vector.broadcast %cst_14 : f32 to vector<8x32xf32>
    %17 = vector.extract_strided_slice %9 {offsets = [0, 0], sizes = [8, 8], strides = [1, 1]} : vector<8x32xf32> to vector<8x8xf32>
    %18 = arith.truncf %17 : vector<8x8xf32> to vector<8x8xbf16>
    %19 = vector.extract_strided_slice %15 {offsets = [0, 0], sizes = [8, 8], strides = [1, 1]} : vector<8x64xf32> to vector<8x8xf32>
    %20 = arith.truncf %19 : vector<8x8xf32> to vector<8x8xbf16>
    %21 = vector.extract_strided_slice %15 {offsets = [0, 32], sizes = [8, 8], strides = [1, 1]} : vector<8x64xf32> to vector<8x8xf32>
    %22 = arith.truncf %21 : vector<8x8xf32> to vector<8x8xbf16>
    %cst_15 = arith.constant dense<0.000000e+00> : vector<8x8xf32>
    %23 = tpu.matmul %18, %20, %cst_15 {dimension_numbers = #tpu.dot_dimension_numbers<[1], [1], [0], [0], [0, 0, 1, 0], [], []>} : vector<8x8xbf16>, vector<8x8xbf16>, vector<8x8xf32> -> vector<8x8xf32>
    %cst_16 = arith.constant dense<0xFF800000> : vector<8xf32>
    %24 = vector.multi_reduction <maximumf>, %23, %cst_16 [1] : vector<8x8xf32> to vector<8xf32>
    %25 = vector.shape_cast %24 : vector<8xf32> to vector<8x1xf32>
    %26 = vector.broadcast %25 : vector<8x1xf32> to vector<8x8xf32>
    %27 = arith.subf %23, %26 : vector<8x8xf32>
    %28 = math.exp %27 : vector<8x8xf32>
    %cst_17 = arith.constant dense<0.000000e+00> : vector<8xf32>
    %29 = vector.multi_reduction <add>, %28, %cst_17 [1] : vector<8x8xf32> to vector<8xf32>
    %30 = vector.shape_cast %29 : vector<8xf32> to vector<8x1xf32>
    %31 = tpu.reciprocal %30 {approx = true} : vector<8x1xf32> -> vector<8x1xf32>
    %32 = vector.broadcast %31 : vector<8x1xf32> to vector<8x8xf32>
    %33 = arith.mulf %28, %32 : vector<8x8xf32>
    %34 = arith.truncf %33 : vector<8x8xf32> to vector<8x8xbf16>
    %cst_18 = arith.constant dense<0.000000e+00> : vector<8x8xf32>
    %35 = tpu.matmul %34, %22, %cst_18 {dimension_numbers = #tpu.dot_dimension_numbers<[1], [0], [0], [1], [0, 0, 1, 1], [], []>} : vector<8x8xbf16>, vector<8x8xbf16>, vector<8x8xf32> -> vector<8x8xf32>
    %36 = arith.truncf %35 : vector<8x8xf32> to vector<8x8xbf16>
    %c0_19 = arith.constant 0 : index
    %c0_20 = arith.constant 0 : index
    %c0_21 = arith.constant 0 : index
    %37 = vector.load %arg8[%c0_19, %c0_20, %c0_21] : memref<4x8x32xbf16, #tpu.memory_space<vmem>>, vector<1x8x32xbf16>
    %38 = vector.shape_cast %37 : vector<1x8x32xbf16> to vector<8x32xbf16>
    %cst_22 = arith.constant dense<0.000000e+00> : vector<8x32xf32>
    %39 = tpu.matmul %36, %38, %cst_22 {dimension_numbers = #tpu.dot_dimension_numbers<[1], [0], [0], [1], [0, 0, 1, 1], [], []>} : vector<8x8xbf16>, vector<8x32xbf16>, vector<8x32xf32> -> vector<8x32xf32>
    %40 = arith.addf %16, %39 : vector<8x32xf32>
    %41 = vector.extract_strided_slice %9 {offsets = [0, 8], sizes = [8, 8], strides = [1, 1]} : vector<8x32xf32> to vector<8x8xf32>
    %42 = arith.truncf %41 : vector<8x8xf32> to vector<8x8xbf16>
    %43 = vector.extract_strided_slice %15 {offsets = [0, 8], sizes = [8, 8], strides = [1, 1]} : vector<8x64xf32> to vector<8x8xf32>
    %44 = arith.truncf %43 : vector<8x8xf32> to vector<8x8xbf16>
    %45 = vector.extract_strided_slice %15 {offsets = [0, 40], sizes = [8, 8], strides = [1, 1]} : vector<8x64xf32> to vector<8x8xf32>
    %46 = arith.truncf %45 : vector<8x8xf32> to vector<8x8xbf16>
    %cst_23 = arith.constant dense<0.000000e+00> : vector<8x8xf32>
    %47 = tpu.matmul %42, %44, %cst_23 {dimension_numbers = #tpu.dot_dimension_numbers<[1], [1], [0], [0], [0, 0, 1, 0], [], []>} : vector<8x8xbf16>, vector<8x8xbf16>, vector<8x8xf32> -> vector<8x8xf32>
    %cst_24 = arith.constant dense<0xFF800000> : vector<8xf32>
    %48 = vector.multi_reduction <maximumf>, %47, %cst_24 [1] : vector<8x8xf32> to vector<8xf32>
    %49 = vector.shape_cast %48 : vector<8xf32> to vector<8x1xf32>
    %50 = vector.broadcast %49 : vector<8x1xf32> to vector<8x8xf32>
    %51 = arith.subf %47, %50 : vector<8x8xf32>
    %52 = math.exp %51 : vector<8x8xf32>
    %cst_25 = arith.constant dense<0.000000e+00> : vector<8xf32>
    %53 = vector.multi_reduction <add>, %52, %cst_25 [1] : vector<8x8xf32> to vector<8xf32>
    %54 = vector.shape_cast %53 : vector<8xf32> to vector<8x1xf32>
    %55 = tpu.reciprocal %54 {approx = true} : vector<8x1xf32> -> vector<8x1xf32>
    %56 = vector.broadcast %55 : vector<8x1xf32> to vector<8x8xf32>
    %57 = arith.mulf %52, %56 : vector<8x8xf32>
    %58 = arith.truncf %57 : vector<8x8xf32> to vector<8x8xbf16>
    %cst_26 = arith.constant dense<0.000000e+00> : vector<8x8xf32>
    %59 = tpu.matmul %58, %46, %cst_26 {dimension_numbers = #tpu.dot_dimension_numbers<[1], [0], [0], [1], [0, 0, 1, 1], [], []>} : vector<8x8xbf16>, vector<8x8xbf16>, vector<8x8xf32> -> vector<8x8xf32>
    %60 = arith.truncf %59 : vector<8x8xf32> to vector<8x8xbf16>
    %c1 = arith.constant 1 : index
    %c0_27 = arith.constant 0 : index
    %c0_28 = arith.constant 0 : index
    %61 = vector.load %arg8[%c1, %c0_27, %c0_28] : memref<4x8x32xbf16, #tpu.memory_space<vmem>>, vector<1x8x32xbf16>
    %62 = vector.shape_cast %61 : vector<1x8x32xbf16> to vector<8x32xbf16>
    %cst_29 = arith.constant dense<0.000000e+00> : vector<8x32xf32>
    %63 = tpu.matmul %60, %62, %cst_29 {dimension_numbers = #tpu.dot_dimension_numbers<[1], [0], [0], [1], [0, 0, 1, 1], [], []>} : vector<8x8xbf16>, vector<8x32xbf16>, vector<8x32xf32> -> vector<8x32xf32>
    %64 = arith.addf %40, %63 : vector<8x32xf32>
    %65 = vector.extract_strided_slice %9 {offsets = [0, 16], sizes = [8, 8], strides = [1, 1]} : vector<8x32xf32> to vector<8x8xf32>
    %66 = arith.truncf %65 : vector<8x8xf32> to vector<8x8xbf16>
    %67 = vector.extract_strided_slice %15 {offsets = [0, 16], sizes = [8, 8], strides = [1, 1]} : vector<8x64xf32> to vector<8x8xf32>
    %68 = arith.truncf %67 : vector<8x8xf32> to vector<8x8xbf16>
    %69 = vector.extract_strided_slice %15 {offsets = [0, 48], sizes = [8, 8], strides = [1, 1]} : vector<8x64xf32> to vector<8x8xf32>
    %70 = arith.truncf %69 : vector<8x8xf32> to vector<8x8xbf16>
    %cst_30 = arith.constant dense<0.000000e+00> : vector<8x8xf32>
    %71 = tpu.matmul %66, %68, %cst_30 {dimension_numbers = #tpu.dot_dimension_numbers<[1], [1], [0], [0], [0, 0, 1, 0], [], []>} : vector<8x8xbf16>, vector<8x8xbf16>, vector<8x8xf32> -> vector<8x8xf32>
    %cst_31 = arith.constant dense<0xFF800000> : vector<8xf32>
    %72 = vector.multi_reduction <maximumf>, %71, %cst_31 [1] : vector<8x8xf32> to vector<8xf32>
    %73 = vector.shape_cast %72 : vector<8xf32> to vector<8x1xf32>
    %74 = vector.broadcast %73 : vector<8x1xf32> to vector<8x8xf32>
    %75 = arith.subf %71, %74 : vector<8x8xf32>
    %76 = math.exp %75 : vector<8x8xf32>
    %cst_32 = arith.constant dense<0.000000e+00> : vector<8xf32>
    %77 = vector.multi_reduction <add>, %76, %cst_32 [1] : vector<8x8xf32> to vector<8xf32>
    %78 = vector.shape_cast %77 : vector<8xf32> to vector<8x1xf32>
    %79 = tpu.reciprocal %78 {approx = true} : vector<8x1xf32> -> vector<8x1xf32>
    %80 = vector.broadcast %79 : vector<8x1xf32> to vector<8x8xf32>
    %81 = arith.mulf %76, %80 : vector<8x8xf32>
    %82 = arith.truncf %81 : vector<8x8xf32> to vector<8x8xbf16>
    %cst_33 = arith.constant dense<0.000000e+00> : vector<8x8xf32>
    %83 = tpu.matmul %82, %70, %cst_33 {dimension_numbers = #tpu.dot_dimension_numbers<[1], [0], [0], [1], [0, 0, 1, 1], [], []>} : vector<8x8xbf16>, vector<8x8xbf16>, vector<8x8xf32> -> vector<8x8xf32>
    %84 = arith.truncf %83 : vector<8x8xf32> to vector<8x8xbf16>
    %c2 = arith.constant 2 : index
    %c0_34 = arith.constant 0 : index
    %c0_35 = arith.constant 0 : index
    %85 = vector.load %arg8[%c2, %c0_34, %c0_35] : memref<4x8x32xbf16, #tpu.memory_space<vmem>>, vector<1x8x32xbf16>
    %86 = vector.shape_cast %85 : vector<1x8x32xbf16> to vector<8x32xbf16>
    %cst_36 = arith.constant dense<0.000000e+00> : vector<8x32xf32>
    %87 = tpu.matmul %84, %86, %cst_36 {dimension_numbers = #tpu.dot_dimension_numbers<[1], [0], [0], [1], [0, 0, 1, 1], [], []>} : vector<8x8xbf16>, vector<8x32xbf16>, vector<8x32xf32> -> vector<8x32xf32>
    %88 = arith.addf %64, %87 : vector<8x32xf32>
    %89 = vector.extract_strided_slice %9 {offsets = [0, 24], sizes = [8, 8], strides = [1, 1]} : vector<8x32xf32> to vector<8x8xf32>
    %90 = arith.truncf %89 : vector<8x8xf32> to vector<8x8xbf16>
    %91 = vector.extract_strided_slice %15 {offsets = [0, 24], sizes = [8, 8], strides = [1, 1]} : vector<8x64xf32> to vector<8x8xf32>
    %92 = arith.truncf %91 : vector<8x8xf32> to vector<8x8xbf16>
    %93 = vector.extract_strided_slice %15 {offsets = [0, 56], sizes = [8, 8], strides = [1, 1]} : vector<8x64xf32> to vector<8x8xf32>
    %94 = arith.truncf %93 : vector<8x8xf32> to vector<8x8xbf16>
    %cst_37 = arith.constant dense<0.000000e+00> : vector<8x8xf32>
    %95 = tpu.matmul %90, %92, %cst_37 {dimension_numbers = #tpu.dot_dimension_numbers<[1], [1], [0], [0], [0, 0, 1, 0], [], []>} : vector<8x8xbf16>, vector<8x8xbf16>, vector<8x8xf32> -> vector<8x8xf32>
    %cst_38 = arith.constant dense<0xFF800000> : vector<8xf32>
    %96 = vector.multi_reduction <maximumf>, %95, %cst_38 [1] : vector<8x8xf32> to vector<8xf32>
    %97 = vector.shape_cast %96 : vector<8xf32> to vector<8x1xf32>
    %98 = vector.broadcast %97 : vector<8x1xf32> to vector<8x8xf32>
    %99 = arith.subf %95, %98 : vector<8x8xf32>
    %100 = math.exp %99 : vector<8x8xf32>
    %cst_39 = arith.constant dense<0.000000e+00> : vector<8xf32>
    %101 = vector.multi_reduction <add>, %100, %cst_39 [1] : vector<8x8xf32> to vector<8xf32>
    %102 = vector.shape_cast %101 : vector<8xf32> to vector<8x1xf32>
    %103 = tpu.reciprocal %102 {approx = true} : vector<8x1xf32> -> vector<8x1xf32>
    %104 = vector.broadcast %103 : vector<8x1xf32> to vector<8x8xf32>
    %105 = arith.mulf %100, %104 : vector<8x8xf32>
    %106 = arith.truncf %105 : vector<8x8xf32> to vector<8x8xbf16>
    %cst_40 = arith.constant dense<0.000000e+00> : vector<8x8xf32>
    %107 = tpu.matmul %106, %94, %cst_40 {dimension_numbers = #tpu.dot_dimension_numbers<[1], [0], [0], [1], [0, 0, 1, 1], [], []>} : vector<8x8xbf16>, vector<8x8xbf16>, vector<8x8xf32> -> vector<8x8xf32>
    %108 = arith.truncf %107 : vector<8x8xf32> to vector<8x8xbf16>
    %c3 = arith.constant 3 : index
    %c0_41 = arith.constant 0 : index
    %c0_42 = arith.constant 0 : index
    %109 = vector.load %arg8[%c3, %c0_41, %c0_42] : memref<4x8x32xbf16, #tpu.memory_space<vmem>>, vector<1x8x32xbf16>
    %110 = vector.shape_cast %109 : vector<1x8x32xbf16> to vector<8x32xbf16>
    %cst_43 = arith.constant dense<0.000000e+00> : vector<8x32xf32>
    %111 = tpu.matmul %108, %110, %cst_43 {dimension_numbers = #tpu.dot_dimension_numbers<[1], [0], [0], [1], [0, 0, 1, 1], [], []>} : vector<8x8xbf16>, vector<8x32xbf16>, vector<8x32xf32> -> vector<8x32xf32>
    %112 = arith.addf %88, %111 : vector<8x32xf32>
    %113 = arith.addf %1, %112 : vector<8x32xf32>
    %c0_44 = arith.constant 0 : index
    %c0_45 = arith.constant 0 : index
    %114 = vector.load %arg9[%c0_44, %c0_45] : memref<1x32xf32, #tpu.memory_space<vmem>>, vector<1x32xf32>
    %115 = vector.broadcast %114 : vector<1x32xf32> to vector<8x32xf32>
    %116 = arith.addf %113, %115 : vector<8x32xf32>
    %cst_46 = arith.constant dense<0.000000e+00> : vector<8xf32>
    %117 = vector.multi_reduction <add>, %116, %cst_46 [1] : vector<8x32xf32> to vector<8xf32>
    %118 = vector.shape_cast %117 : vector<8xf32> to vector<8x1xf32>
    %cst_47 = arith.constant 3.200000e+01 : f32
    %119 = vector.broadcast %cst_47 : f32 to vector<8x1xf32>
    %120 = arith.divf %118, %119 : vector<8x1xf32>
    %121 = vector.broadcast %120 : vector<8x1xf32> to vector<8x32xf32>
    %122 = arith.subf %116, %121 : vector<8x32xf32>
    %123 = arith.mulf %122, %122 : vector<8x32xf32>
    %cst_48 = arith.constant dense<0.000000e+00> : vector<8xf32>
    %124 = vector.multi_reduction <add>, %123, %cst_48 [1] : vector<8x32xf32> to vector<8xf32>
    %125 = vector.shape_cast %124 : vector<8xf32> to vector<8x1xf32>
    %cst_49 = arith.constant 3.200000e+01 : f32
    %126 = vector.broadcast %cst_49 : f32 to vector<8x1xf32>
    %127 = arith.divf %125, %126 : vector<8x1xf32>
    %cst_50 = arith.constant 9.99999974E-6 : f32
    %128 = vector.broadcast %cst_50 : f32 to vector<8x1xf32>
    %129 = arith.addf %127, %128 : vector<8x1xf32>
    %130 = math.rsqrt %129 : vector<8x1xf32>
    %131 = vector.broadcast %130 : vector<8x1xf32> to vector<8x32xf32>
    %132 = arith.mulf %122, %131 : vector<8x32xf32>
    %c0_51 = arith.constant 0 : index
    %c0_52 = arith.constant 0 : index
    %133 = vector.load %arg10[%c0_51, %c0_52] : memref<1x32xf32, #tpu.memory_space<vmem>>, vector<1x32xf32>
    %134 = vector.broadcast %133 : vector<1x32xf32> to vector<8x32xf32>
    %135 = arith.mulf %132, %134 : vector<8x32xf32>
    %c0_53 = arith.constant 0 : index
    %c0_54 = arith.constant 0 : index
    %136 = vector.load %arg11[%c0_53, %c0_54] : memref<1x32xf32, #tpu.memory_space<vmem>>, vector<1x32xf32>
    %137 = vector.broadcast %136 : vector<1x32xf32> to vector<8x32xf32>
    %138 = arith.addf %135, %137 : vector<8x32xf32>
    %c0_55 = arith.constant 0 : index
    %c0_56 = arith.constant 0 : index
    %c0_57 = arith.constant 0 : index
    %139 = vector.load %arg12[%c0_55, %c0_56, %c0_57] : memref<1x8x32xf32, #tpu.memory_space<vmem>>, vector<1x8x32xf32>
    %140 = vector.shape_cast %139 : vector<1x8x32xf32> to vector<8x32xf32>
    %141 = vector.shape_cast %138 : vector<8x32xf32> to vector<1x8x32xf32>
    tpu.vector_store %arg12[%c0_55, %c0_56, %c0_57], %141 {strides = array<i32>} : memref<1x8x32xf32, #tpu.memory_space<vmem>>, vector<1x8x32xf32>,
    return
  }
  func.func @transform_0(%arg0: i32, %arg1: i32) -> (i32, i32, i32) {
    %c0_i32 = arith.constant 0 : i32
    %c0_i32_0 = arith.constant 0 : i32
    return %arg0, %arg1, %c0_i32 : i32, i32, i32
  }
  func.func @transform_1(%arg0: i32, %arg1: i32) -> (i32, i32, i32) {
    %c0_i32 = arith.constant 0 : i32
    %c0_i32_0 = arith.constant 0 : i32
    %c0_i32_1 = arith.constant 0 : i32
    return %arg0, %c0_i32, %c0_i32_0 : i32, i32, i32
  }
  func.func @transform_2(%arg0: i32, %arg1: i32) -> (i32, i32) {
    %c0_i32 = arith.constant 0 : i32
    %c0_i32_0 = arith.constant 0 : i32
    %c0_i32_1 = arith.constant 0 : i32
    return %c0_i32, %c0_i32_0 : i32, i32
  }
  func.func @transform_3(%arg0: i32, %arg1: i32) -> (i32, i32) {
    %c0_i32 = arith.constant 0 : i32
    %c0_i32_0 = arith.constant 0 : i32
    %c0_i32_1 = arith.constant 0 : i32
    return %c0_i32, %c0_i32_0 : i32, i32
  }
  func.func @transform_4(%arg0: i32, %arg1: i32) -> (i32, i32) {
    %c0_i32 = arith.constant 0 : i32
    %c0_i32_0 = arith.constant 0 : i32
    %c0_i32_1 = arith.constant 0 : i32
    return %c0_i32, %c0_i32_0 : i32, i32
  }
  func.func @transform_5(%arg0: i32, %arg1: i32) -> (i32, i32) {
    %c0_i32 = arith.constant 0 : i32
    %c0_i32_0 = arith.constant 0 : i32
    %c0_i32_1 = arith.constant 0 : i32
    return %c0_i32, %c0_i32_0 : i32, i32
  }
  func.func @transform_6(%arg0: i32, %arg1: i32) -> (i32, i32, i32) {
    %c0_i32 = arith.constant 0 : i32
    %c0_i32_0 = arith.constant 0 : i32
    %c0_i32_1 = arith.constant 0 : i32
    %c0_i32_2 = arith.constant 0 : i32
    return %c0_i32, %c0_i32_0, %c0_i32_1 : i32, i32, i32
  }
  func.func @transform_7(%arg0: i32, %arg1: i32) -> (i32, i32) {
    %c0_i32 = arith.constant 0 : i32
    %c0_i32_0 = arith.constant 0 : i32
    %c0_i32_1 = arith.constant 0 : i32
    return %c0_i32, %c0_i32_0 : i32, i32
  }
  func.func @transform_8(%arg0: i32, %arg1: i32) -> (i32, i32) {
    %c0_i32 = arith.constant 0 : i32
    %c0_i32_0 = arith.constant 0 : i32
    %c0_i32_1 = arith.constant 0 : i32
    return %c0_i32, %c0_i32_0 : i32, i32
  }
  func.func @transform_9(%arg0: i32, %arg1: i32) -> (i32, i32) {
    %c0_i32 = arith.constant 0 : i32
    %c0_i32_0 = arith.constant 0 : i32
    %c0_i32_1 = arith.constant 0 : i32
    return %c0_i32, %c0_i32_0 : i32, i32
  }
  func.func @transform_10(%arg0: i32, %arg1: i32) -> (i32, i32, i32) {
    %c0_i32 = arith.constant 0 : i32
    %c0_i32_0 = arith.constant 0 : i32
    return %arg0, %arg1, %c0_i32 : i32, i32, i32
  }
}

</mosaic_0001>

<bundles_post_ra>
// kernel: tpu_custom_call.1
= control target key start
LH: loop header
LB: loop body
LE: loop exit
PB: predicated region body
PF: predicated region fallthrough
CT: control target
= control target key end

     0   :  { %s2359_s0 = inlined_call_operand.hbm [shape: f32[2,8,32], index: 0, kind: input, shape index: {}]   ;;  %s2360_s1 = inlined_call_operand.hbm [shape: f32[2,8,32], index: 1, kind: input, shape index: {}]   ;;  %s2361_s2 = inlined_call_operand.hbm [shape: bf16[32,32], index: 2, kind: input, shape index: {}]   ;;  %s2362_s3 = inlined_call_operand.vmem [shape: f32[1,32], index: 3, kind: input, shape index: {}]   ;;  %s2363_s4 = inlined_call_operand.hbm [shape: bf16[32,64], index: 4, kind: input, shape index: {}]   ;;  %s2364_s5 = inlined_call_operand.vmem [shape: f32[1,64], index: 5, kind: input, shape index: {}]   ;;  %s2365_s6 = inlined_call_operand.hbm [shape: bf16[4,8,32], index: 6, kind: input, shape index: {}]   ;;  %s2366_s7 = inlined_call_operand.vmem [shape: f32[1,32], index: 7, kind: input, shape index: {}]   ;;  %s2367_s8 = inlined_call_operand.vmem [shape: f32[1,32], index: 8, kind: input, shape index: {}]   ;;  %s2368_s9 = inlined_call_operand.vmem [shape: f32[1,32], index: 9, kind: input, shape index: {}]   ;;  %s2369_s10 = inlined_call_operand.hbm [shape: f32[2,8,32], index: 10, kind: output, shape index: {}]  }
   0x1   :  { %2376 = sst [smem:[#allocation20_spill]] %s2359_s0 }
   0x2   :  { %2377 = sst [smem:[#allocation21_spill]] %s2361_s2 }
   0x3   :  { %2378 = sst [smem:[#allocation22_spill]] %s2363_s4 }
   0x4   :  { %2379 = sst [smem:[#allocation23_spill]] %s2365_s6 }
   0x5   :  { %2380 = sst [smem:[#allocation24_spill]] %s2369_s10 }
   0x6   :  { %15 = vsyncpa [#allocation3], 0 }
   0x7   :  { %17 = vsyncpa [#allocation3 + $0x1], 0 }
   0x8   :  { %18 = vsyncpa [#allocation6], 0 }
   0x9   :  { %20 = vsyncpa [#allocation6 + $0x1], 0 }
   0xa   :  { %21 = vsyncpa [#allocation9], 0 }
   0xb   :  { %22 = vsyncpa [#allocation4], 0 }
   0xc   :  { %24 = vsyncpa [#allocation4 + $0x1], 0  ;;  %s2029_s13 = smov 0   ;;  %s2031_s14 = smov 0  }
   0xd   :  { %s2033_s15 = smov 0   ;;  %s2035_s16 = smov 0  }
   0xe   :  { %s2037_s17 = smov 0   ;;  %s2039_s18 = smov 0  }
   0xf LB: > { %2381 = sst [smem:[#allocation17_spill]] %s1935_s13  ;;  %s2060_s19 = sadd.s32 4294967295, %s1955_s18   ;;  %s1955_s18 = sphi %s2039_s18, %s30_s18   ;;  %s1951_s17 = sphi %s2037_s17, %s2410_s17   ;;  %s1947_s16 = sphi %s2035_s16, %s2409_s16   ;;  %s1943_s15 = sphi %s2033_s15, %s2408_s15   ;;  %s1939_s14 = sphi %s2031_s14, %s2407_s14   ;;  %s1935_s13 = sphi %s2029_s13, %s2406_s13  }
  0x10   : > { %s1436_s20 = sadd.s32 4294967294, %s1955_s18   ;;  %p64_p0 = scmp.ne.s32.totalorder %s1939_s14, %s1935_s13 }
  0x11   : > { %p2370_p1 = scmp.eq.s32.totalorder %s2060_s19, 0  ;;  %p290_p3 = scmp.eq.s32.totalorder %s1436_s20, 1 }
  0x12   : > { %p1437_p5 = scmp.ge.s32.totalorder %s1955_s18, 1  ;;  %p297_p7 = scmp.lt.s32.totalorder %s1955_s18, 3 }
  0x13   : > { %p2069_p4 = por %p2370_p1, %p64_p0  ;;  %p2074_p6 = por %p290_p3, %p64_p0 }
  0x14   : > { %p2079_p8 = pnand %p1437_p5, %p297_p7  ;;  %s1957_s24 = smov [#allocation7]  }
  0x15   : > { %s2382_s21 = scalar_select %p2069_p4, 1, 0 }
  0x16   : > { %s2383_s22 = scalar_select %p2074_p6, 1, 0 }
  0x17   : > { %s309_s25 = sshll.u32 %s1957_s24, 4  ;;  %p1616_p9 = pneg %p2079_p8  ;;  %s310_s25 = int_to_ptr.vmem [resolvable:$true] %s309_s25 }
  0x18   : > { %2384 = sst [smem:[#allocation18_spill]] %s2383_s22  ;;  %s1958_s27 = smov [#allocation8]  }
  0x19   : > { %p2088_p11 = pnand %p1616_p9, %p2370_p1  ;;  %s325_s28 = sshll.u32 %s1958_s27, 4  ;;  %s326_s28 = int_to_ptr.vmem [resolvable:$true] %s325_s28 }
  0x1a   : > { %s1959_s29 = smov [#allocation10]   ;;  %s1740_s11 = scalar_lea.vmem %s310_s25, 256 }
  0x1b   : > { %s341_s30 = sshll.u32 %s1959_s29, 4  ;;  %p1731_p12 = pneg %p2088_p11  ;;  %s342_s30 = int_to_ptr.vmem [resolvable:$true] %s341_s30 }
  0x1c   : > { %p1741_p13 = scmp.ne.s32.totalorder %s310_s25, %s1740_s11  ;;  %p1748_p5 = scmp.lt.s32.totalorder %s310_s25, %s310_s25 }
  0x1d   : > { %p1749_p7 = scmp.lt.s32.totalorder %s1740_s11, %s1740_s11 }
  0x1e   : > { %p1743_p0 = pnand %p1741_p13, %p1731_p12 }
  0x1f   : > { %p1750_p9 = por %p1749_p7, %p1748_p5 }
  0x20   : > { %p1744_p3 = pneg %p1743_p0 }
  0x22   : > { %p1751_p10 = pnand %p1750_p9, %p1744_p3 }
  0x24   : > { %1754 = shalt.err (!%p1751_p10)
}
  0x25   : > { %s1960_s12 = smov 64   ;;  %s1961_s20 = smov 4  }
  0x26   : > { %s2387_s2 = sld [smem:[#allocation21_spill]]  ;;  %s1766_s29 = scalar_lea.vmem %s326_s28, 256 }
  0x27   : > { %p1767_p1 = scmp.ne.s32.totalorder %s326_s28, %s1766_s29  ;;  %p1774_p2 = scmp.lt.s32.totalorder %s326_s28, %s326_s28 }
  0x28   : > { %p1775_p6 = scmp.lt.s32.totalorder %s1766_s29, %s1766_s29 }
  0x29   : > { %p1769_p13 = pnand %p1767_p1, %p1731_p12 }
  0x2a   : > { %p1776_p5 = por %p1775_p6, %p1774_p2 }
  0x2b   : > { %p1770_p0 = pneg %p1769_p13 }
  0x2c   : > { %1619 = dma.hbm_to_vmem [thread:$0]  (!%p2088_p11), %s2387_s2, 256, %s310_s25, [#allocation6], %s1960_s12, %s1960_s12, %s1961_s20  }
  0x2d   : > { %p1777_p3 = pnand %p1776_p5, %p1770_p0 }
  0x2f   : > { %1780 = shalt.err (!%p1777_p3)
}
  0x30   : > { %s2388_s4 = sld [smem:[#allocation22_spill]]  ;;  %s1792_s25 = scalar_lea.vmem %s342_s30, 256 }
  0x31   : > { %p1793_p10 = scmp.ne.s32.totalorder %s342_s30, %s1792_s25  ;;  %p1800_p9 = scmp.lt.s32.totalorder %s342_s30, %s342_s30 }
  0x32   : > { %p1801_p13 = scmp.lt.s32.totalorder %s1792_s25, %s1792_s25 }
  0x33   : > { %p1795_p7 = pnand %p1793_p10, %p1731_p12 }
  0x34   : > { %p1802_p4 = por %p1801_p13, %p1800_p9 }
  0x35   : > { %p1796_p1 = pneg %p1795_p7 }
  0x36   : > { %1622 = dma.hbm_to_vmem [thread:$0]  (!%p2088_p11), %s2388_s4, 256, %s326_s28, [#allocation9], %s1960_s12, %s1960_s12, %s1961_s20  }
  0x37   : > { %p1803_p2 = pnand %p1802_p4, %p1796_p1 }
  0x39   : > { %1806 = shalt.err (!%p1803_p2)
}
  0x3a   : > { %s2389_s6 = sld [smem:[#allocation23_spill]]  ;;  %s51_s22 = sadd.s32 1, %s1943_s15 }
  0x3b   : > { %s42_s28 = sadd.s32 1, %s1951_s17  ;;  %p58_p4 = scmp.ne.s32.totalorder %s1943_s15, %s1939_s14 }
  0x3c   : > { %p44_p6 = scmp.ge.s32.totalorder %s42_s28, 2  ;;  %p59_p12 = scmp.eq.s32.totalorder %s1955_s18, 0 }
  0x3d   : > { %p2390_p0 = scmp.eq.s32.totalorder %s2060_s19, 1  ;;  %p1640_p3 = scmp.lt.s32.totalorder %s1955_s18, 2 }
  0x3e   : > { %s2412_s28 = smov (%p44_p6, %s42_s28), 0  ;;  %p60_p10 = por %p59_p12, %p58_p4 }
  0x3f   : > { %p2125_p5 = por %p2390_p0, %p58_p4  ;;  %2392 = sst [smem:[#allocation19_spill]] %s2412_s28 }
  0x40   : > { %1625 = dma.hbm_to_vmem [thread:$0]  (!%p2088_p11), %s2389_s6, 256, %s342_s30, [#allocation9], %s1960_s12, %s1960_s12, %s1961_s20  }
  0x41   : > { %s364_s29 = sand.u32 1, %s1943_s15   ;;  %s46_s11 = ssub.s32 %s1951_s17, %s2412_s28 }
  0x42   : > { %p49_p11 = scmp.eq.s32.totalorder %s46_s11, 0  ;;  %s1442_s30 = sshll.u32 %s364_s29, 3 }
  0x43   : > { %s1443_s12 = sshll.u32 %s1951_s17, 7  ;;  %s2393_s0 = sld [smem:[#allocation20_spill]] }
  0x44   : > { %s2137_s20 = scalar_select %p49_p11, %s1943_s15, %s51_s22  }
  0x45   : > { %s368_s2 = scalar_lea.vmem [#allocation2], %s1442_s30  ;;  %p2144_p7 = pnand %p1640_p3, %p60_p10 }
  0x46   : > { %s376_s4 = sshll.u32 %s368_s2, 4  ;;  %s2151_s11 = scalar_lea.hbm %s2360_s1, %s1443_s12  ;;  %s377_s4 = int_to_ptr.vmem [resolvable:$true] %s376_s4 }
  0x47   : > { %s383_s22 = sand.u32 1, %s1955_s18   ;;  %s365_s28 = scalar_lea.sflag [#allocation3], %s364_s29 }
  0x48   : > { %p1809_p1 = pneg %p2144_p7  ;;  %s1820_s25 = scalar_lea.vmem %s377_s4, 128 }
  0x49   : > { %s374_s27 = scalar_lea.hbm %s2393_s0, %s1443_s12  ;;  %p1821_p9 = scmp.ne.s32.totalorder %s377_s4, %s1820_s25 }
  0x4a   : > { %s1962_s2 = smov [#allocation2]  }
  0x4b   : > { %p1823_p13 = pnand %p1821_p9, %p1809_p1  ;;  %s1825_s24 = sshll.u32 %s1962_s2, 4  ;;  %s1826_s24 = int_to_ptr.vmem [resolvable:$false] %s1825_s24 }
  0x4c   : > { %s1827_s0 = scalar_lea.vmem %s1826_s24, 256  ;;  %p1828_p4 = scmp.lt.s32.totalorder %s377_s4, %s1826_s24 }
  0x4d   : > { %p1824_p2 = pneg %p1823_p13  ;;  %p1829_p6 = scmp.lt.s32.totalorder %s1827_s0, %s1820_s25 }
  0x4f   : > { %p1830_p12 = por %p1829_p6, %p1828_p4 }
  0x51   : > { %p1831_p0 = pnand %p1830_p12, %p1824_p2 }
  0x53   : > { %1834 = shalt.err (!%p1831_p0)
}
  0x54   : > { %1629 = dma.hbm_to_vmem [thread:$0]  (!%p2144_p7), %s374_s27, 128, %s377_s4, %s365_s28  }
  0x55   : > { %s387_s10 = scalar_lea.vmem [#allocation5], %s1442_s30  ;;  %s384_s29 = scalar_lea.sflag [#allocation6], %s383_s22 }
  0x56   : > { %s394_s13 = sshll.u32 %s387_s10, 4  ;;  %s1963_s2 = smov [#allocation5]   ;;  %s395_s13 = int_to_ptr.vmem [resolvable:$true] %s394_s13 }
  0x57   : > { %s1848_s12 = scalar_lea.vmem %s395_s13, 128  ;;  %s1853_s24 = sshll.u32 %s1963_s2, 4  ;;  %s1854_s24 = int_to_ptr.vmem [resolvable:$false] %s1853_s24 }
  0x58   : > { %p1849_p3 = scmp.ne.s32.totalorder %s395_s13, %s1848_s12  ;;  %s1855_s0 = scalar_lea.vmem %s1854_s24, 256 }
  0x59   : > { %p1856_p9 = scmp.lt.s32.totalorder %s395_s13, %s1854_s24  ;;  %p1857_p13 = scmp.lt.s32.totalorder %s1855_s0, %s1848_s12 }
  0x5a   : > { %p1851_p10 = pnand %p1849_p3, %p1809_p1 }
  0x5b   : > { %p1858_p2 = por %p1857_p13, %p1856_p9 }
  0x5c   : > { %p1852_p11 = pneg %p1851_p10 }
  0x5e   : > { %p1859_p4 = pnand %p1858_p2, %p1852_p11 }
  0x60   : > { %1862 = shalt.err (!%p1859_p4)
}
  0x61   : > { %1632 = dma.hbm_to_vmem [thread:$0]  (!%p2144_p7), %s2151_s11, 128, %s395_s13, %s384_s29  }
  0x62   : > { %403 = sbr.rel (%p2079_p8) target bundleno = 2891 (0xb4b), region = 60  ;;  %s2170_s4 = sand.u32 (!%p2079_p8), 1, %s1939_s14  }
  0x63   : > { %s2173_s28 = sshll.u32 (!%p2079_p8), %s2170_s4, 3  ;;  %s406_s30 = scalar_lea.sflag (!%p2079_p8), [#allocation3], %s2170_s4 }
  0x64   : > { %s409_s27 = scalar_lea.vmem (!%p2079_p8), [#allocation2], %s2173_s28  ;;  %p2395_p1 = scmp.ne.s32.totalorder (!%p2079_p8), %s2382_s21, 0 }
  0x67   : > { %1914 = dma.done.wait (%p2395_p1), %s406_s30, 128  }
  0x68   : > { %1916 = vsyncadd (%p2395_p1), %s406_s30, 4294967168  ;;  %s414_s6 = sand.u32 1, %s2060_s19   ;;  %s418_s11 = scalar_lea.vmem [#allocation5], %s2173_s28 }
  0x69   : > { %s415_s23 = scalar_lea.sflag [#allocation6], %s414_s6 }
  0x6a   : > { %1918 = dma.done.wait (%p2395_p1), %s415_s23, 128  }
  0x6b   : > { %1920 = vsyncadd (%p2395_p1), %s415_s23, 4294967168  ;;  %p2396_p8 = scmp.eq.s32.totalorder %s2060_s19, 0 }
  0x6d   : > { %1922 = dma.done.wait (%p2396_p8), [#allocation6], 256   ;;  %p2397_p7 = pmov %p2396_p8 }
  0x6f   : > { %1924 = vsyncadd (%p2397_p7), [#allocation6], 4294967040  ;;  %p2398_p6 = pmov %p2397_p7 }
  0x71   : > { %1926 = dma.done.wait (%p2398_p6), [#allocation9], 512   ;;  %p2399_p12 = pmov %p2398_p6 }
  0x72   : > { %v1964_v0 = vmov 0.0   ;;  %vm1965_vm0 = vmmov 0   ;;  %v1707_v1 = vld [vmem:[#allocation8 + $0x8] sm:$0xff]   ;;  %v1708_v2 = vld [vmem:[#allocation7 + $0x8] sm:$0xff]   ;;  %v1709_v3 = vld [vmem:[#allocation8] sm:$0xff]   ;;  %vm499_vm1 = vcmask 261120  }
  0x73   : > { %1928 = vsyncadd (%p2399_p12), [#allocation9], 4294966784  ;;  %1518 = vmatprep.subr.bf16.mxu1 %v1964_v0  ;;  %1510 = vmatprep.subr.bf16.mxu0 %v1964_v0  ;;  %v1710_v4 = vld [vmem:[#allocation7] sm:$0xff]   ;;  %v474_v5 = vld [vmem:[%s418_s11] sm:$0xff]  ;;  %vm612_vm2 = vcmask 64512   ;;  %s1966_s10 = smov 120  }
  0x74   : > { %1522 = vmatprep.mubr.msk.bf16.mxu1 %vm1965_vm0, %v1964_v0  ;;  %1514 = vmatprep.mubr.msk.bf16.mxu0 %vm1965_vm0, %v1964_v0  ;;  %v2203_v6 = vld [vmem:[%s409_s27] sm:$0xff]  ;;  %v543_v7 = vpack.c.bf16 %v474_v5, %v474_v5  ;;  %s1967_s13 = smov 96   ;;  %vm677_vm3 = vcmask 1043456   ;;  %s1968_s29 = smov 88  }
  0x75   : > { %1519 = vmatpush3.bf16.msra.mxu1 %v1707_v1  ;;  %1511 = vmatpush3.bf16.msra.mxu0 %v1708_v2  ;;  %v475_v8 = vpack.c.bf16 %v2203_v6, %v2203_v6  ;;  %v1457_v9 = vld [vmem:[%s2364_s5] ss:$0 sm:$0xff]  ;;  %s1969_s12 = smov 112   ;;  %v836_v53 = vld [vmem:[#allocation10 + $0x4] sm:$0xf]  ;;  %s1970_s2 = smov 80  }
  0x76   : > { %1520 = vmatprep.subr.bf16.mxu1 %v1964_v0  ;;  %1512 = vmatprep.subr.bf16.mxu0 %v1964_v0  ;;  %v1453_v10 = vld [vmem:[%s2362_s3] ss:$0 sm:$0xff]  ;;  %v841_v54 = vsel %vm677_vm3, %v836_v53, 0  ;;  %s1971_s24 = smov 104   ;;  %s1972_s0 = smov 72  }
  0x77   : > { %v722_v59 = vld [vmem:[#allocation10] sm:$0xf]  ;;  %s1477_s21 = sshll.u32 %s1947_s16, 7  ;;  %s471_s22 = scalar_lea.vmem [#allocation11], %s2173_s28 }
  0x78   : > { %v887_v62 = vsel %vm677_vm3, %v722_v59, 0  ;;  %s1304_s25 = sshll.u32 %s471_s22, 4  ;;  %s1305_s25 = int_to_ptr.vmem [resolvable:$true] %s1304_s25 }
  0x79   : > { %1521 = vmatpush3.bf16.msra.mxu1 %v1709_v3  ;;  %1513 = vmatpush3.bf16.msra.mxu0 %v1710_v4 }
  0x7a   : > { %1532 = vmatprep.subr.bf16.mxu1 %v1964_v0  ;;  %1526 = vmatprep.subr.bf16.mxu0 %v1964_v0 }
  0x7c   : > { %1523 = vmatmul.mubr.msk.bf16.vlgmr.msra.gmra.mxu1 %vm499_vm1, %v543_v7  ;;  %1515 = vmatmul.mubr.msk.bf16.vlgmr.msra.gmra.mxu0 %vm499_vm1, %v475_v8 }
  0x7d   : > { %1534 = vmatprep.mubr.msk.bf16.mxu1 %vm1965_vm0, %v1964_v0  ;;  %1528 = vmatprep.mubr.msk.bf16.mxu0 %vm1965_vm0, %v1964_v0 }
 0x13c   : > { %v604_v11 = vpop.f32.mrf.mxu1  ;;  %v537_v13 = vpop.f32.mrf.mxu0 }
 0x13d   : > { %v605_v12 = vadd.f32 %v1457_v9, %v604_v11  ;;  %v538_v15 = vadd.f32 %v1453_v10, %v537_v13 }
 0x13e   : > { %v1524_v14 = vpop.f32.mrf.mxu1  ;;  %v1516_v17 = vpop.f32.mrf.mxu0 }
 0x13f   : > { %v2221_v16 = vpack.c.bf16 %v605_v12, %v605_v12  ;;  %v2223_v19 = vpack.c.bf16 %v538_v15, %v538_v15 }
 0x140   : > { %v607_v18 = vpop.f32.mrf.mxu1  ;;  %v540_v21 = vpop.f32.mrf.mxu0 }
 0x141   : > { %726 = vrot.lane.b32.xlu0 %v2221_v16, %s1966_s10  ;;  %v617_v20 = vsel %vm612_vm2, %v2221_v16, 0 }
 0x142   : > { %v1525_v22 = vpop.f32.mrf.mxu1  ;;  %1527 = vmatpush3.bf16.xpose.msra.mxu0 %v617_v20  ;;  %v1517_v23 = vpop.f32.mrf.mxu0 }
 0x143   : > { %1538 = vmatprep.subr.bf16.mxu0 %v1964_v0 }
 0x145   : > { %724 = vrot.lane.b32.xlu0 %v2223_v19, %s1966_s10 }
 0x149   : > { %1529 = vmatmul.mubr.msk.bf16.vlgmr.msra.gmra.mxu0 %vm612_vm2, %v2223_v19 }
 0x14a   : > { %1540 = vmatprep.mubr.msk.bf16.mxu0 %vm1965_vm0, %v1964_v0 }
 0x1b3   : > { %v727_v24 = vpop.permute.xlu0 %726 }
 0x1b4   : > { %v732_v25 = vsel %vm612_vm2, %v727_v24, 0 }
 0x1b5   : > { %1539 = vmatpush3.bf16.xpose.msra.mxu0 %v732_v25 }
 0x1b6   : > { %1550 = vmatprep.subr.bf16.mxu0 %v1964_v0 }
 0x1b7   : > { %v725_v26 = vpop.permute.xlu0 %724 }
 0x1bc   : > { %1541 = vmatmul.mubr.msk.bf16.vlgmr.msra.gmra.mxu0 %vm612_vm2, %v725_v26 }
 0x1bd   : > { %1552 = vmatprep.mubr.msk.bf16.mxu0 %vm1965_vm0, %v1964_v0  ;;  %1551 = vmatpush3.bf16.msra.mxu0 %v841_v54 }
 0x1be   : > { %1562 = vmatprep.subr.bf16.mxu0 %v1964_v0 }
 0x209   : > { %v653_v27 = vpop.f32.mrf.mxu0 }
 0x20a   : > { %v659_v28 = vsel %vm612_vm2, %v653_v27, -inf }
 0x20b   : > { %660 = vmax.xlane.f32.xlu1 %v659_v28  ;;  %v1530_v29 = vpop.f32.mrf.mxu0 }
 0x20d   : > { %v656_v30 = vpop.f32.mrf.mxu0 }
 0x20f   : > { %v1531_v31 = vpop.f32.mrf.mxu0 }
 0x27c   : > { %v768_v32 = vpop.f32.mrf.mxu0 }
 0x27d   : > { %v774_v33 = vsel %vm612_vm2, %v768_v32, -inf }
 0x27e   : > { %775 = vmax.xlane.f32.xlu1 %v774_v33  ;;  %v1542_v34 = vpop.f32.mrf.mxu0 }
 0x280   : > { %v771_v35 = vpop.f32.mrf.mxu0 }
 0x282   : > { %v1543_v36 = vpop.f32.mrf.mxu0 }
 0x28f   : > { %672 = vrot.lane.b32.xlu1 %v2221_v16, %s1967_s13 }
 0x294   : > { %v661_v37 = vpop.xlane.xlu1 %660 }
 0x295   : > { %v662_v38 = vsub.f32 %v653_v27, %v661_v37 }
 0x297   : > { %v663_v39 = vmul.f32 1.442695, %v662_v38 }
 0x299   : > { %1711 = vpow2.f32 %v663_v39 }
 0x2a6   : > { %v1712_v40 = vpop.eup %1711 }
 0x2a7   : > { %v665_v41 = vsel %vm612_vm2, %v1712_v40, 0.0 }
 0x2a8   : > { %666 = vadd.xlane.f32.xlu0 %v665_v41 }
 0x307   : > { %v776_v42 = vpop.xlane.xlu1 %775 }
 0x308   : > { %v777_v43 = vsub.f32 %v768_v32, %v776_v42  ;;  %v1041_v42 = vld [vmem:[#allocation10 + $0x8] sm:$0xf] }
 0x30a   : > { %v778_v44 = vmul.f32 1.442695, %v777_v43  ;;  %v1046_v43 = vsel %vm677_vm3, %v1041_v42, 0 }
 0x30b   : > { %v673_v45 = vpop.permute.xlu1 %672 }
 0x30c   : > { %1713 = vpow2.f32 %v778_v44  ;;  %v679_v46 = vsel %vm677_vm3, %v673_v45, 0 }
 0x30d   : > { %1533 = vmatpush3.bf16.msra.mxu1 %v679_v46 }
 0x30e   : > { %1544 = vmatprep.subr.bf16.mxu1 %v1964_v0 }
 0x319   : > { %v1714_v47 = vpop.eup %1713 }
 0x31a   : > { %v780_v48 = vsel %vm612_vm2, %v1714_v47, 0.0 }
 0x31b   : > { %781 = vadd.xlane.f32.xlu1 %v780_v48 }
 0x32c   : > { %786 = vrot.lane.b32.xlu1 %v2221_v16, %s1968_s29  ;;  %s2400_s29 = sld [smem:[#allocation24_spill]] }
 0x330   : > { %931 = vrot.lane.b32.xlu1 %v2221_v16, %s1969_s12 }
 0x331   : > { %v667_v49 = vpop.xlane.xlu0 %666 }
 0x332   : > { %1715 = vrcp.f32 %v667_v49 }
 0x334   : > { %929 = vrot.lane.b32.xlu1 %v2223_v19, %s1969_s12  ;;  %s1302_s12 = scalar_lea.hbm %s2400_s29, %s1477_s21 }
 0x33f   : > { %v1716_v50 = vpop.eup %1715 }
 0x340   : > { %v669_v51 = vmul.f32 %v1716_v50, %v1712_v40 }
 0x342   : > { %v670_v52 = vpack.c.bf16 %v669_v51, %v669_v51 }
 0x344   : > { %1535 = vmatmul.mubr.msk.bf16.vlgmr.msra.gmra.mxu1 %vm612_vm2, %v670_v52 }
 0x345   : > { %1546 = vmatprep.mubr.msk.bf16.mxu1 %vm1965_vm0, %v1964_v0 }
 0x3a4   : > { %v782_v55 = vpop.xlane.xlu1 %781 }
 0x3a5   : > { %1717 = vrcp.f32 %v782_v55 }
 0x3a8   : > { %v787_v56 = vpop.permute.xlu1 %786 }
 0x3a9   : > { %v792_v57 = vsel %vm677_vm3, %v787_v56, 0 }
 0x3aa   : > { %1545 = vmatpush3.bf16.msra.mxu1 %v792_v57 }
 0x3ab   : > { %1556 = vmatprep.subr.bf16.mxu1 %v1964_v0 }
 0x3ac   : > { %v932_v5 = vpop.permute.xlu1 %931 }
 0x3ad   : > { %v937_v10 = vsel %vm612_vm2, %v932_v5, 0 }
 0x3b0   : > { %v930_v13 = vpop.permute.xlu1 %929 }
 0x3b2   : > { %v1718_v58 = vpop.eup %1717 }
 0x3b3   : > { %v784_v60 = vmul.f32 %v1718_v58, %v1714_v47 }
 0x3b5   : > { %v785_v61 = vpack.c.bf16 %v784_v60, %v784_v60  ;;  %v1201_v60 = vld [vmem:[#allocation10 + $0xc] sm:$0xf] }
 0x3b7   : > { %1547 = vmatmul.mubr.msk.bf16.vlgmr.msra.gmra.mxu1 %vm612_vm2, %v785_v61 }
 0x3b8   : > { %1557 = vmatpush3.bf16.msra.mxu1 %v887_v62  ;;  %1558 = vmatprep.mubr.msk.bf16.mxu1 %vm1965_vm0, %v1964_v0  ;;  %v1206_v62 = vsel %vm677_vm3, %v1201_v60, 0 }
 0x3b9   : > { %1568 = vmatprep.subr.bf16.mxu1 %v1964_v0 }
 0x404   : > { %v715_v63 = vpop.f32.mrf.mxu1 }
 0x405   : > { %v721_v1 = vpack.c.bf16 %v715_v63, %v715_v63 }
 0x406   : > { %v1536_v2 = vpop.f32.mrf.mxu1 }
 0x407   : > { %1559 = vmatmul.mubr.msk.bf16.vlgmr.msra.gmra.mxu1 %vm612_vm2, %v721_v1 }
 0x408   : > { %v718_v3 = vpop.f32.mrf.mxu1  ;;  %1570 = vmatprep.mubr.msk.bf16.mxu1 %vm1965_vm0, %v1964_v0 }
 0x40a   : > { %v1537_v4 = vpop.f32.mrf.mxu1 }
 0x477   : > { %v828_v7 = vpop.f32.mrf.mxu1 }
 0x478   : > { %v834_v8 = vpack.c.bf16 %v828_v7, %v828_v7 }
 0x479   : > { %v1548_v9 = vpop.f32.mrf.mxu1 }
 0x47a   : > { %1553 = vmatmul.mubr.msk.bf16.vlgmr.msra.gmra.mxu0 %vm612_vm2, %v834_v8 }
 0x47b   : > { %1563 = vmatpush3.bf16.xpose.msra.mxu0 %v937_v10  ;;  %v831_v11 = vpop.f32.mrf.mxu1  ;;  %1564 = vmatprep.mubr.msk.bf16.mxu0 %vm1965_vm0, %v1964_v0 }
 0x47c   : > { %1574 = vmatprep.subr.bf16.mxu0 %v1964_v0 }
 0x47d   : > { %v1549_v12 = vpop.f32.mrf.mxu1 }
 0x482   : > { %1565 = vmatmul.mubr.msk.bf16.vlgmr.msra.gmra.mxu0 %vm612_vm2, %v930_v13 }
 0x483   : > { %1576 = vmatprep.mubr.msk.bf16.mxu0 %vm1965_vm0, %v1964_v0  ;;  %1575 = vmatpush3.bf16.msra.mxu0 %v1046_v43 }
 0x484   : > { %1586 = vmatprep.subr.bf16.mxu0 %v1964_v0 }
 0x4c7   : > { %v2272_v14 = vpop.f32.mrf.mxu1 }
 0x4c9   : > { %v1560_v15 = vpop.f32.mrf.mxu1 }
 0x4cb   : > { %v926_v17 = vpop.f32.mrf.mxu1 }
 0x4cd   : > { %v1561_v18 = vpop.f32.mrf.mxu1 }
 0x4ce   : > { %v1473_v18 = vld [vmem:[%s2366_s7] ss:$0 sm:$0xff] }
 0x53a   : > { %v2274_v20 = vpop.f32.mrf.mxu0 }
 0x53c   : > { %v1554_v21 = vpop.f32.mrf.mxu0 }
 0x53e   : > { %v880_v22 = vpop.f32.mrf.mxu0 }
 0x540   : > { %v1555_v23 = vpop.f32.mrf.mxu0 }
 0x542   : > { %v973_v24 = vpop.f32.mrf.mxu0 }
 0x543   : > { %v979_v25 = vsel %vm612_vm2, %v973_v24, -inf }
 0x544   : > { %980 = vmax.xlane.f32.xlu0 %v979_v25  ;;  %v1566_v26 = vpop.f32.mrf.mxu0 }
 0x546   : > { %v976_v27 = vpop.f32.mrf.mxu0 }
 0x548   : > { %v1567_v28 = vpop.f32.mrf.mxu0 }
 0x55a   : > { %991 = vrot.lane.b32.xlu0 %v2221_v16, %s1970_s2  ;;  %s1290_s2 = scalar_lea.sflag [#allocation4], %s2170_s4 }
 0x55e   : > { %1091 = vrot.lane.b32.xlu0 %v2221_v16, %s1971_s24 }
 0x562   : > { %1089 = vrot.lane.b32.xlu0 %v2223_v19, %s1971_s24  ;;  %s1863_s24 = scalar_lea.vmem %s1305_s25, 128 }
 0x563   : > { %p1864_p0 = scmp.ne.s32.totalorder %s1305_s25, %s1863_s24 }
 0x565   : > { %p1865_p3 = pnand %p1864_p0, %p2125_p5 }
 0x567   : > { %p1866_p10 = pneg %p1865_p3 }
 0x5cd   : > { %v981_v29 = vpop.xlane.xlu0 %980 }
 0x5ce   : > { %v982_v30 = vsub.f32 %v973_v24, %v981_v29 }
 0x5d0   : > { %v983_v31 = vmul.f32 1.442695, %v982_v30 }
 0x5d1   : > { %v992_v32 = vpop.permute.xlu0 %991 }
 0x5d2   : > { %1719 = vpow2.f32 %v983_v31  ;;  %v997_v33 = vsel %vm677_vm3, %v992_v32, 0 }
 0x5d3   : > { %1569 = vmatpush3.bf16.msra.mxu1 %v997_v33  ;;  %v1474_v33 = vld [vmem:[%s2367_s8] ss:$0 sm:$0xff] }
 0x5d4   : > { %1580 = vmatprep.subr.bf16.mxu1 %v1964_v0 }
 0x5d5   : > { %v1092_v39 = vpop.permute.xlu0 %1091 }
 0x5d6   : > { %v1097_v40 = vsel %vm612_vm2, %v1092_v39, 0 }
 0x5d9   : > { %v1090_v41 = vpop.permute.xlu0 %1089 }
 0x5df   : > { %v1720_v34 = vpop.eup %1719 }
 0x5e0   : > { %v985_v35 = vsel %vm612_vm2, %v1720_v34, 0.0 }
 0x5e1   : > { %986 = vadd.xlane.f32.xlu1 %v985_v35  ;;  %v1475_v35 = vld [vmem:[%s2368_s9] ss:$0 sm:$0xff] }
 0x66a   : > { %v987_v36 = vpop.xlane.xlu1 %986 }
 0x66b   : > { %1721 = vrcp.f32 %v987_v36 }
 0x678   : > { %v1722_v37 = vpop.eup %1721 }
 0x679   : > { %v989_v38 = vmul.f32 %v1722_v37, %v1720_v34 }
 0x67b   : > { %v990_v19 = vpack.c.bf16 %v989_v38, %v989_v38 }
 0x67d   : > { %1571 = vmatmul.mubr.msk.bf16.vlgmr.msra.gmra.mxu1 %vm612_vm2, %v990_v19 }
 0x67e   : > { %1581 = vmatpush3.bf16.xpose.msra.mxu1 %v1097_v40  ;;  %1582 = vmatprep.mubr.msk.bf16.mxu1 %vm1965_vm0, %v1964_v0 }
 0x67f   : > { %1592 = vmatprep.subr.bf16.mxu1 %v1964_v0 }
 0x685   : > { %1583 = vmatmul.mubr.msk.bf16.vlgmr.msra.gmra.mxu1 %vm612_vm2, %v1090_v41 }
 0x686   : > { %1594 = vmatprep.mubr.msk.bf16.mxu1 %vm1965_vm0, %v1964_v0  ;;  %1593 = vmatpush3.bf16.msra.mxu1 %v1206_v62 }
 0x73d   : > { %v1033_v44 = vpop.f32.mrf.mxu1 }
 0x73e   : > { %v1039_v45 = vpack.c.bf16 %v1033_v44, %v1033_v44 }
 0x73f   : > { %v1572_v46 = vpop.f32.mrf.mxu1 }
 0x740   : > { %1577 = vmatmul.mubr.msk.bf16.vlgmr.msra.gmra.mxu0 %vm612_vm2, %v1039_v45 }
 0x741   : > { %v1036_v47 = vpop.f32.mrf.mxu1  ;;  %1588 = vmatprep.mubr.msk.bf16.mxu0 %vm1965_vm0, %v1964_v0  ;;  %v924_v0 = vadd.f32 %v2272_v14, %v2274_v20 }
 0x743   : > { %v1573_v48 = vpop.f32.mrf.mxu1 }
 0x745   : > { %v1133_v49 = vpop.f32.mrf.mxu1 }
 0x746   : > { %v1139_v50 = vsel %vm612_vm2, %v1133_v49, -inf }
 0x747   : > { %1140 = vmax.xlane.f32.xlu0 %v1139_v50  ;;  %v1584_v51 = vpop.f32.mrf.mxu1 }
 0x749   : > { %v1136_v52 = vpop.f32.mrf.mxu1 }
 0x74b   : > { %v1585_v53 = vpop.f32.mrf.mxu1 }
 0x7d0   : > { %v1141_v54 = vpop.xlane.xlu0 %1140 }
 0x7d1   : > { %v1142_v55 = vsub.f32 %v1133_v49, %v1141_v54 }
 0x7d3   : > { %v1143_v56 = vmul.f32 1.442695, %v1142_v55 }
 0x7d5   : > { %1723 = vpow2.f32 %v1143_v56 }
 0x7e2   : > { %v1724_v57 = vpop.eup %1723 }
 0x7e3   : > { %v1145_v58 = vsel %vm612_vm2, %v1724_v57, 0.0 }
 0x7e4   : > { %1146 = vadd.xlane.f32.xlu1 %v1145_v58 }
 0x7f5   : > { %1151 = vrot.lane.b32.xlu1 %v2221_v16, %s1972_s0  ;;  %s1973_s0 = smov [#allocation11]  }
 0x7f6   : > { %s1867_s30 = sshll.u32 %s1973_s0, 4  ;;  %s1868_s30 = int_to_ptr.vmem [resolvable:$false] %s1867_s30 }
 0x7f7   : > { %s1869_s16 = scalar_lea.vmem %s1868_s30, 256  ;;  %p1870_p11 = scmp.lt.s32.totalorder %s1305_s25, %s1868_s30 }
 0x7f8   : > { %p1871_p9 = scmp.lt.s32.totalorder %s1869_s16, %s1863_s24 }
 0x7fa   : > { %p1872_p13 = por %p1871_p9, %p1870_p11 }
 0x7fc   : > { %p1873_p2 = pnand %p1872_p13, %p1866_p10 }
 0x800   : > { %v1082_v59 = vpop.f32.mrf.mxu0 }
 0x801   : > { %v1088_v61 = vadd.f32 %v1082_v59, %v924_v0 }
 0x802   : > { %v1578_v63 = vpop.f32.mrf.mxu0 }
 0x804   : > { %v1085_v1 = vpop.f32.mrf.mxu0 }
 0x806   : > { %v1579_v2 = vpop.f32.mrf.mxu0 }
 0x86d   : > { %v1147_v3 = vpop.xlane.xlu1 %1146 }
 0x86e   : > { %1725 = vrcp.f32 %v1147_v3 }
 0x871   : > { %v1152_v4 = vpop.permute.xlu1 %1151 }
 0x872   : > { %v1157_v5 = vsel %vm677_vm3, %v1152_v4, 0 }
 0x873   : > { %1587 = vmatpush3.bf16.msra.mxu0 %v1157_v5 }
 0x87b   : > { %v1726_v7 = vpop.eup %1725 }
 0x87c   : > { %v1149_v16 = vmul.f32 %v1726_v7, %v1724_v57 }
 0x87e   : > { %v1150_v8 = vpack.c.bf16 %v1149_v16, %v1149_v16 }
 0x880   : > { %1589 = vmatmul.mubr.msk.bf16.vlgmr.msra.gmra.mxu0 %vm612_vm2, %v1150_v8 }
 0x940   : > { %v1193_v9 = vpop.f32.mrf.mxu0 }
 0x941   : > { %v1199_v10 = vpack.c.bf16 %v1193_v9, %v1193_v9 }
 0x942   : > { %v1590_v11 = vpop.f32.mrf.mxu0 }
 0x943   : > { %1595 = vmatmul.mubr.msk.bf16.vlgmr.msra.gmra.mxu1 %vm612_vm2, %v1199_v10 }
 0x944   : > { %v1196_v12 = vpop.f32.mrf.mxu0 }
 0x946   : > { %v1591_v13 = vpop.f32.mrf.mxu0 }
 0xa03   : > { %v1242_v14 = vpop.f32.mrf.mxu1 }
 0xa04   : > { %v1248_v15 = vadd.f32 %v1242_v14, %v1088_v61 }
 0xa05   : > { %v1596_v17 = vpop.f32.mrf.mxu1 }
 0xa06   : > { %v1249_v20 = vadd.f32 %v1248_v15, %v2203_v6 }
 0xa07   : > { %v1245_v21 = vpop.f32.mrf.mxu1 }
 0xa08   : > { %v1257_v22 = vadd.f32 %v1473_v18, %v1249_v20 }
 0xa09   : > { %v1597_v23 = vpop.f32.mrf.mxu1 }
 0xa0a   : > { %v1258_v24 = vsel %vm499_vm1, %v1257_v22, 0.0 }
 0xa0b   : > { %1259 = vadd.xlane.f32.xlu1 %v1258_v24 }
 0xa94   : > { %v1260_v25 = vpop.xlane.xlu1 %1259 }
 0xa95   : > { %v1262_v26 = vmul.f32 0.03125, %v1260_v25 }
 0xa97   : > { %v1263_v27 = vsub.f32 %v1257_v22, %v1262_v26 }
 0xa99   : > { %v1264_v28 = vmul.f32 %v1263_v27, %v1263_v27 }
 0xa9b   : > { %v1265_v29 = vsel %vm499_vm1, %v1264_v28, 0.0 }
 0xa9c   : > { %1266 = vadd.xlane.f32.xlu0 %v1265_v29 }
 0xb25   : > { %v1267_v30 = vpop.xlane.xlu0 %1266 }
 0xb26   : > { %v1268_v31 = vmul.f32 0.03125, %v1267_v30 }
 0xb28   : > { %v1269_v32 = vadd.f32 1e-05, %v1268_v31 }
 0xb2a   : > { %1727 = vrsqrt.f32 %v1269_v32 }
 0xb37   : > { %v1728_v6 = vpop.eup %1727 }
 0xb38   : > { %v1271_v34 = vmul.f32 %v1728_v6, %v1263_v27 }
 0xb3a   : > { %v1279_v36 = vmul.f32 %v1474_v33, %v1271_v34 }
 0xb3c   : > { %v1287_v37 = vadd.f32 %v1475_v35, %v1279_v36 }
 0xb3e   : > { %1288 = vst.msk [vmem:[%s471_s22] sm:$0xff] %vm499_vm1, %v1287_v37 }
 0xb3f   : > { %1876 = shalt.err (!%p1873_p2)
}
 0xb40   : > { %s1877_s28 = scalar_lea.hbm %s1302_s12, 128  ;;  %s1881_s6 = scalar_lea.hbm %s2400_s29, 256 }
 0xb41   : > { %p1878_p4 = scmp.ne.s32.totalorder %s1302_s12, %s1877_s28  ;;  %p1882_p7 = scmp.lt.s32.totalorder %s1302_s12, %s2400_s29 }
 0xb42   : > { %p1883_p6 = scmp.lt.s32.totalorder %s1881_s6, %s1877_s28 }
 0xb43   : > { %p1879_p1 = pnand %p1878_p4, %p2125_p5 }
 0xb44   : > { %p1884_p12 = por %p1883_p6, %p1882_p7 }
 0xb45   : > { %p1880_p8 = pneg %p1879_p1 }
 0xb47   : > { %p1885_p0 = pnand %p1884_p12, %p1880_p8 }
 0xb49   : > { %1888 = shalt.err (!%p1885_p0)
}
 0xb4a   : > { %1614 = dma.vmem_to_hbm [thread:$0]  (%p2125_p5), %s1305_s25, 128, %s1302_s12, %s1290_s2  }
 0xb4b PF: > { %s2401_s19 = sld [smem:[#allocation17_spill]]  ;;  %p2404_p10 = scmp.ge.s32.totalorder %s1955_s18, 2 }
 0xb4c   : > { %s2402_s21 = sld [smem:[#allocation18_spill]] }
 0xb51   : > { %s1316_s22 = sand.u32 1, %s2401_s19  }
 0xb52   : > { %p2403_p3 = scmp.ne.s32.totalorder %s2402_s21, 0  ;;  %s1317_s10 = scalar_lea.sflag [#allocation4], %s1316_s22 }
 0xb54   : > { %p1634_p11 = pnand %p2404_p10, %p2403_p3 }
 0xb56   : > { %p1635_p9 = pneg %p1634_p11 }
 0xb58   : > { %1930 = dma.done.wait (%p1635_p9), %s1317_s10, 128  }
 0xb59   : > { %1932 = vsyncadd (%p1635_p9), %s1317_s10, 4294967168  ;;  %s30_s18 = sadd.s32 1, %s1955_s18   ;;  %s2405_s26 = sld [smem:[#allocation19_spill]] }
 0xb5a   : > { %p27_p13 = scmp.ge.s32.totalorder %s30_s18, 4   ;;  %s2406_s13 = smov %s1939_s14 }
 0xb5b   : > { %s2407_s14 = smov %s1943_s15  ;;  %s2408_s15 = smov %s2137_s20 }
 0xb5c   : > { %s2409_s16 = smov %s1951_s17  ;;  %29 = sbr.rel (!%p27_p13) target bundleno = 15 (0xf), region = 133 }
 0xb5f   : > { %s2410_s17 = smov %s2405_s26 }
 0xb61   :  { %1322 = vsyncpa [#allocation3], 1 }
 0xb62   :  { %1324 = vsyncpa [#allocation3 + $0x1], 1 }
 0xb63   :  { %1325 = vsyncpa [#allocation6], 1 }
 0xb64   :  { %1327 = vsyncpa [#allocation6 + $0x1], 1 }
 0xb65   :  { %1328 = vsyncpa [#allocation9], 1 }
 0xb66   :  { %1329 = vsyncpa [#allocation4], 1 }
 0xb67   :  { %1331 = vsyncpa [#allocation4 + $0x1], 1 }

// kernel: tpu_custom_call.1
= control target key start
LH: loop header
LB: loop body
LE: loop exit
PB: predicated region body
PF: predicated region fallthrough
CT: control target
= control target key end

     0   :  { %s2359_s0 = inlined_call_operand.hbm [shape: f32[2,8,32], index: 0, kind: input, shape index: {}]   ;;  %s2360_s1 = inlined_call_operand.hbm [shape: f32[2,8,32], index: 1, kind: input, shape index: {}]   ;;  %s2361_s2 = inlined_call_operand.hbm [shape: bf16[32,32], index: 2, kind: input, shape index: {}]   ;;  %s2362_s3 = inlined_call_operand.vmem [shape: f32[1,32], index: 3, kind: input, shape index: {}]   ;;  %s2363_s4 = inlined_call_operand.hbm [shape: bf16[32,64], index: 4, kind: input, shape index: {}]   ;;  %s2364_s5 = inlined_call_operand.vmem [shape: f32[1,64], index: 5, kind: input, shape index: {}]   ;;  %s2365_s6 = inlined_call_operand.hbm [shape: bf16[4,8,32], index: 6, kind: input, shape index: {}]   ;;  %s2366_s7 = inlined_call_operand.vmem [shape: f32[1,32], index: 7, kind: input, shape index: {}]   ;;  %s2367_s8 = inlined_call_operand.vmem [shape: f32[1,32], index: 8, kind: input, shape index: {}]   ;;  %s2368_s9 = inlined_call_operand.vmem [shape: f32[1,32], index: 9, kind: input, shape index: {}]   ;;  %s2369_s10 = inlined_call_operand.hbm [shape: f32[2,8,32], index: 10, kind: output, shape index: {}]  }
   0x1   :  { %2376 = sst [smem:[#allocation20_spill]] %s2359_s0 }
   0x2   :  { %2377 = sst [smem:[#allocation21_spill]] %s2361_s2 }
   0x3   :  { %2378 = sst [smem:[#allocation22_spill]] %s2363_s4 }
   0x4   :  { %2379 = sst [smem:[#allocation23_spill]] %s2365_s6 }
   0x5   :  { %2380 = sst [smem:[#allocation24_spill]] %s2369_s10 }
   0x6   :  { %15 = vsyncpa [#allocation3], 0 }
   0x7   :  { %17 = vsyncpa [#allocation3 + $0x1], 0 }
   0x8   :  { %18 = vsyncpa [#allocation6], 0 }
   0x9   :  { %20 = vsyncpa [#allocation6 + $0x1], 0 }
   0xa   :  { %21 = vsyncpa [#allocation9], 0 }
   0xb   :  { %22 = vsyncpa [#allocation4], 0 }
   0xc   :  { %24 = vsyncpa [#allocation4 + $0x1], 0  ;;  %s2029_s13 = smov 0   ;;  %s2031_s14 = smov 0  }
   0xd   :  { %s2033_s15 = smov 0   ;;  %s2035_s16 = smov 0  }
   0xe   :  { %s2037_s17 = smov 0   ;;  %s2039_s18 = smov 0  }
   0xf LB: > { %2381 = sst [smem:[#allocation17_spill]] %s1935_s13  ;;  %s2060_s19 = sadd.s32 4294967295, %s1955_s18   ;;  %s1955_s18 = sphi %s2039_s18, %s30_s18   ;;  %s1951_s17 = sphi %s2037_s17, %s2410_s17   ;;  %s1947_s16 = sphi %s2035_s16, %s2409_s16   ;;  %s1943_s15 = sphi %s2033_s15, %s2408_s15   ;;  %s1939_s14 = sphi %s2031_s14, %s2407_s14   ;;  %s1935_s13 = sphi %s2029_s13, %s2406_s13  }
  0x10   : > { %s1436_s20 = sadd.s32 4294967294, %s1955_s18   ;;  %p64_p0 = scmp.ne.s32.totalorder %s1939_s14, %s1935_s13 }
  0x11   : > { %p2370_p1 = scmp.eq.s32.totalorder %s2060_s19, 0  ;;  %p290_p3 = scmp.eq.s32.totalorder %s1436_s20, 1 }
  0x12   : > { %p1437_p5 = scmp.ge.s32.totalorder %s1955_s18, 1  ;;  %p297_p7 = scmp.lt.s32.totalorder %s1955_s18, 3 }
  0x13   : > { %p2069_p4 = por %p2370_p1, %p64_p0  ;;  %p2074_p6 = por %p290_p3, %p64_p0 }
  0x14   : > { %p2079_p8 = pnand %p1437_p5, %p297_p7  ;;  %s1957_s24 = smov [#allocation7]  }
  0x15   : > { %s2382_s21 = scalar_select %p2069_p4, 1, 0 }
  0x16   : > { %s2383_s22 = scalar_select %p2074_p6, 1, 0 }
  0x17   : > { %s309_s25 = sshll.u32 %s1957_s24, 4  ;;  %p1616_p9 = pneg %p2079_p8  ;;  %s310_s25 = int_to_ptr.vmem [resolvable:$true] %s309_s25 }
  0x18   : > { %2384 = sst [smem:[#allocation18_spill]] %s2383_s22  ;;  %s1958_s27 = smov [#allocation8]  }
  0x19   : > { %p2088_p11 = pnand %p1616_p9, %p2370_p1  ;;  %s325_s28 = sshll.u32 %s1958_s27, 4  ;;  %s326_s28 = int_to_ptr.vmem [resolvable:$true] %s325_s28 }
  0x1a   : > { %s1959_s29 = smov [#allocation10]   ;;  %s1740_s11 = scalar_lea.vmem %s310_s25, 256 }
  0x1b   : > { %s341_s30 = sshll.u32 %s1959_s29, 4  ;;  %p1731_p12 = pneg %p2088_p11  ;;  %s342_s30 = int_to_ptr.vmem [resolvable:$true] %s341_s30 }
  0x1c   : > { %p1741_p13 = scmp.ne.s32.totalorder %s310_s25, %s1740_s11  ;;  %p1748_p5 = scmp.lt.s32.totalorder %s310_s25, %s310_s25 }
  0x1d   : > { %p1749_p7 = scmp.lt.s32.totalorder %s1740_s11, %s1740_s11 }
  0x1e   : > { %p1743_p0 = pnand %p1741_p13, %p1731_p12 }
  0x1f   : > { %p1750_p9 = por %p1749_p7, %p1748_p5 }
  0x20   : > { %p1744_p3 = pneg %p1743_p0 }
  0x22   : > { %p1751_p10 = pnand %p1750_p9, %p1744_p3 }
  0x24   : > { %1754 = shalt.err (!%p1751_p10)
}
  0x25   : > { %s1960_s12 = smov 64   ;;  %s1961_s20 = smov 4  }
  0x26   : > { %s2387_s2 = sld [smem:[#allocation21_spill]]  ;;  %s1766_s29 = scalar_lea.vmem %s326_s28, 256 }
  0x27   : > { %p1767_p1 = scmp.ne.s32.totalorder %s326_s28, %s1766_s29  ;;  %p1774_p2 = scmp.lt.s32.totalorder %s326_s28, %s326_s28 }
  0x28   : > { %p1775_p6 = scmp.lt.s32.totalorder %s1766_s29, %s1766_s29 }
  0x29   : > { %p1769_p13 = pnand %p1767_p1, %p1731_p12 }
  0x2a   : > { %p1776_p5 = por %p1775_p6, %p1774_p2 }
  0x2b   : > { %p1770_p0 = pneg %p1769_p13 }
  0x2c   : > { %1619 = dma.hbm_to_vmem [thread:$0]  (!%p2088_p11), %s2387_s2, 256, %s310_s25, [#allocation6], %s1960_s12, %s1960_s12, %s1961_s20  }
  0x2d   : > { %p1777_p3 = pnand %p1776_p5, %p1770_p0 }
  0x2f   : > { %1780 = shalt.err (!%p1777_p3)
}
  0x30   : > { %s2388_s4 = sld [smem:[#allocation22_spill]]  ;;  %s1792_s25 = scalar_lea.vmem %s342_s30, 256 }
  0x31   : > { %p1793_p10 = scmp.ne.s32.totalorder %s342_s30, %s1792_s25  ;;  %p1800_p9 = scmp.lt.s32.totalorder %s342_s30, %s342_s30 }
  0x32   : > { %p1801_p13 = scmp.lt.s32.totalorder %s1792_s25, %s1792_s25 }
  0x33   : > { %p1795_p7 = pnand %p1793_p10, %p1731_p12 }
  0x34   : > { %p1802_p4 = por %p1801_p13, %p1800_p9 }
  0x35   : > { %p1796_p1 = pneg %p1795_p7 }
  0x36   : > { %1622 = dma.hbm_to_vmem [thread:$0]  (!%p2088_p11), %s2388_s4, 256, %s326_s28, [#allocation9], %s1960_s12, %s1960_s12, %s1961_s20  }
  0x37   : > { %p1803_p2 = pnand %p1802_p4, %p1796_p1 }
  0x39   : > { %1806 = shalt.err (!%p1803_p2)
}
  0x3a   : > { %s2389_s6 = sld [smem:[#allocation23_spill]]  ;;  %s51_s22 = sadd.s32 1, %s1943_s15 }
  0x3b   : > { %s42_s28 = sadd.s32 1, %s1951_s17  ;;  %p58_p4 = scmp.ne.s32.totalorder %s1943_s15, %s1939_s14 }
  0x3c   : > { %p44_p6 = scmp.ge.s32.totalorder %s42_s28, 2  ;;  %p59_p12 = scmp.eq.s32.totalorder %s1955_s18, 0 }
  0x3d   : > { %p2390_p0 = scmp.eq.s32.totalorder %s2060_s19, 1  ;;  %p1640_p3 = scmp.lt.s32.totalorder %s1955_s18, 2 }
  0x3e   : > { %s2412_s28 = smov (%p44_p6, %s42_s28), 0  ;;  %p60_p10 = por %p59_p12, %p58_p4 }
  0x3f   : > { %p2125_p5 = por %p2390_p0, %p58_p4  ;;  %2392 = sst [smem:[#allocation19_spill]] %s2412_s28 }
  0x40   : > { %1625 = dma.hbm_to_vmem [thread:$0]  (!%p2088_p11), %s2389_s6, 256, %s342_s30, [#allocation9], %s1960_s12, %s1960_s12, %s1961_s20  }
  0x41   : > { %s364_s29 = sand.u32 1, %s1943_s15   ;;  %s46_s11 = ssub.s32 %s1951_s17, %s2412_s28 }
  0x42   : > { %p49_p11 = scmp.eq.s32.totalorder %s46_s11, 0  ;;  %s1442_s30 = sshll.u32 %s364_s29, 3 }
  0x43   : > { %s1443_s12 = sshll.u32 %s1951_s17, 7  ;;  %s2393_s0 = sld [smem:[#allocation20_spill]] }
  0x44   : > { %s2137_s20 = scalar_select %p49_p11, %s1943_s15, %s51_s22  }
  0x45   : > { %s368_s2 = scalar_lea.vmem [#allocation2], %s1442_s30  ;;  %p2144_p7 = pnand %p1640_p3, %p60_p10 }
  0x46   : > { %s376_s4 = sshll.u32 %s368_s2, 4  ;;  %s2151_s11 = scalar_lea.hbm %s2360_s1, %s1443_s12  ;;  %s377_s4 = int_to_ptr.vmem [resolvable:$true] %s376_s4 }
  0x47   : > { %s383_s22 = sand.u32 1, %s1955_s18   ;;  %s365_s28 = scalar_lea.sflag [#allocation3], %s364_s29 }
  0x48   : > { %p1809_p1 = pneg %p2144_p7  ;;  %s1820_s25 = scalar_lea.vmem %s377_s4, 128 }
  0x49   : > { %s374_s27 = scalar_lea.hbm %s2393_s0, %s1443_s12  ;;  %p1821_p9 = scmp.ne.s32.totalorder %s377_s4, %s1820_s25 }
  0x4a   : > { %s1962_s2 = smov [#allocation2]  }
  0x4b   : > { %p1823_p13 = pnand %p1821_p9, %p1809_p1  ;;  %s1825_s24 = sshll.u32 %s1962_s2, 4  ;;  %s1826_s24 = int_to_ptr.vmem [resolvable:$false] %s1825_s24 }
  0x4c   : > { %s1827_s0 = scalar_lea.vmem %s1826_s24, 256  ;;  %p1828_p4 = scmp.lt.s32.totalorder %s377_s4, %s1826_s24 }
  0x4d   : > { %p1824_p2 = pneg %p1823_p13  ;;  %p1829_p6 = scmp.lt.s32.totalorder %s1827_s0, %s1820_s25 }
  0x4f   : > { %p1830_p12 = por %p1829_p6, %p1828_p4 }
  0x51   : > { %p1831_p0 = pnand %p1830_p12, %p1824_p2 }
  0x53   : > { %1834 = shalt.err (!%p1831_p0)
}
  0x54   : > { %1629 = dma.hbm_to_vmem [thread:$0]  (!%p2144_p7), %s374_s27, 128, %s377_s4, %s365_s28  }
  0x55   : > { %s387_s10 = scalar_lea.vmem [#allocation5], %s1442_s30  ;;  %s384_s29 = scalar_lea.sflag [#allocation6], %s383_s22 }
  0x56   : > { %s394_s13 = sshll.u32 %s387_s10, 4  ;;  %s1963_s2 = smov [#allocation5]   ;;  %s395_s13 = int_to_ptr.vmem [resolvable:$true] %s394_s13 }
  0x57   : > { %s1848_s12 = scalar_lea.vmem %s395_s13, 128  ;;  %s1853_s24 = sshll.u32 %s1963_s2, 4  ;;  %s1854_s24 = int_to_ptr.vmem [resolvable:$false] %s1853_s24 }
  0x58   : > { %p1849_p3 = scmp.ne.s32.totalorder %s395_s13, %s1848_s12  ;;  %s1855_s0 = scalar_lea.vmem %s1854_s24, 256 }
  0x59   : > { %p1856_p9 = scmp.lt.s32.totalorder %s395_s13, %s1854_s24  ;;  %p1857_p13 = scmp.lt.s32.totalorder %s1855_s0, %s1848_s12 }
  0x5a   : > { %p1851_p10 = pnand %p1849_p3, %p1809_p1 }
  0x5b   : > { %p1858_p2 = por %p1857_p13, %p1856_p9 }
  0x5c   : > { %p1852_p11 = pneg %p1851_p10 }
  0x5e   : > { %p1859_p4 = pnand %p1858_p2, %p1852_p11 }
  0x60   : > { %1862 = shalt.err (!%p1859_p4)
}
  0x61   : > { %1632 = dma.hbm_to_vmem [thread:$0]  (!%p2144_p7), %s2151_s11, 128, %s395_s13, %s384_s29  }
  0x62   : > { %403 = sbr.rel (%p2079_p8) target bundleno = 2891 (0xb4b), region = 60  ;;  %s2170_s4 = sand.u32 (!%p2079_p8), 1, %s1939_s14  }
  0x63   : > { %s2173_s28 = sshll.u32 (!%p2079_p8), %s2170_s4, 3  ;;  %s406_s30 = scalar_lea.sflag (!%p2079_p8), [#allocation3], %s2170_s4 }
  0x64   : > { %s409_s27 = scalar_lea.vmem (!%p2079_p8), [#allocation2], %s2173_s28  ;;  %p2395_p1 = scmp.ne.s32.totalorder (!%p2079_p8), %s2382_s21, 0 }
  0x67   : > { %1914 = dma.done.wait (%p2395_p1), %s406_s30, 128  }
  0x68   : > { %1916 = vsyncadd (%p2395_p1), %s406_s30, 4294967168  ;;  %s414_s6 = sand.u32 1, %s2060_s19   ;;  %s418_s11 = scalar_lea.vmem [#allocation5], %s2173_s28 }
  0x69   : > { %s415_s23 = scalar_lea.sflag [#allocation6], %s414_s6 }
  0x6a   : > { %1918 = dma.done.wait (%p2395_p1), %s415_s23, 128  }
  0x6b   : > { %1920 = vsyncadd (%p2395_p1), %s415_s23, 4294967168  ;;  %p2396_p8 = scmp.eq.s32.totalorder %s2060_s19, 0 }
  0x6d   : > { %1922 = dma.done.wait (%p2396_p8), [#allocation6], 256   ;;  %p2397_p7 = pmov %p2396_p8 }
  0x6f   : > { %1924 = vsyncadd (%p2397_p7), [#allocation6], 4294967040  ;;  %p2398_p6 = pmov %p2397_p7 }
  0x71   : > { %1926 = dma.done.wait (%p2398_p6), [#allocation9], 512   ;;  %p2399_p12 = pmov %p2398_p6 }
  0x72   : > { %v1964_v0 = vmov 0.0   ;;  %vm1965_vm0 = vmmov 0   ;;  %v1707_v1 = vld [vmem:[#allocation8 + $0x8] sm:$0xff]   ;;  %v1708_v2 = vld [vmem:[#allocation7 + $0x8] sm:$0xff]   ;;  %v1709_v3 = vld [vmem:[#allocation8] sm:$0xff]   ;;  %vm499_vm1 = vcmask 261120  }
  0x73   : > { %1928 = vsyncadd (%p2399_p12), [#allocation9], 4294966784  ;;  %1518 = vmatprep.subr.bf16.mxu1 %v1964_v0  ;;  %1510 = vmatprep.subr.bf16.mxu0 %v1964_v0  ;;  %v1710_v4 = vld [vmem:[#allocation7] sm:$0xff]   ;;  %v474_v5 = vld [vmem:[%s418_s11] sm:$0xff]  ;;  %vm612_vm2 = vcmask 64512   ;;  %s1966_s10 = smov 120  }
  0x74   : > { %1522 = vmatprep.mubr.msk.bf16.mxu1 %vm1965_vm0, %v1964_v0  ;;  %1514 = vmatprep.mubr.msk.bf16.mxu0 %vm1965_vm0, %v1964_v0  ;;  %v2203_v6 = vld [vmem:[%s409_s27] sm:$0xff]  ;;  %v543_v7 = vpack.c.bf16 %v474_v5, %v474_v5  ;;  %s1967_s13 = smov 96   ;;  %vm677_vm3 = vcmask 1043456   ;;  %s1968_s29 = smov 88  }
  0x75   : > { %1519 = vmatpush3.bf16.msra.mxu1 %v1707_v1  ;;  %1511 = vmatpush3.bf16.msra.mxu0 %v1708_v2  ;;  %v475_v8 = vpack.c.bf16 %v2203_v6, %v2203_v6  ;;  %v1457_v9 = vld [vmem:[%s2364_s5] ss:$0 sm:$0xff]  ;;  %s1969_s12 = smov 112   ;;  %v836_v53 = vld [vmem:[#allocation10 + $0x4] sm:$0xf]  ;;  %s1970_s2 = smov 80  }
  0x76   : > { %1520 = vmatprep.subr.bf16.mxu1 %v1964_v0  ;;  %1512 = vmatprep.subr.bf16.mxu0 %v1964_v0  ;;  %v1453_v10 = vld [vmem:[%s2362_s3] ss:$0 sm:$0xff]  ;;  %v841_v54 = vsel %vm677_vm3, %v836_v53, 0  ;;  %s1971_s24 = smov 104   ;;  %s1972_s0 = smov 72  }
  0x77   : > { %v722_v59 = vld [vmem:[#allocation10] sm:$0xf]  ;;  %s1477_s21 = sshll.u32 %s1947_s16, 7  ;;  %s471_s22 = scalar_lea.vmem [#allocation11], %s2173_s28 }
  0x78   : > { %v887_v62 = vsel %vm677_vm3, %v722_v59, 0  ;;  %s1304_s25 = sshll.u32 %s471_s22, 4  ;;  %s1305_s25 = int_to_ptr.vmem [resolvable:$true] %s1304_s25 }
  0x79   : > { %1521 = vmatpush3.bf16.msra.mxu1 %v1709_v3  ;;  %1513 = vmatpush3.bf16.msra.mxu0 %v1710_v4 }
  0x7a   : > { %1532 = vmatprep.subr.bf16.mxu1 %v1964_v0  ;;  %1526 = vmatprep.subr.bf16.mxu0 %v1964_v0 }
  0x7c   : > { %1523 = vmatmul.mubr.msk.bf16.vlgmr.msra.gmra.mxu1 %vm499_vm1, %v543_v7  ;;  %1515 = vmatmul.mubr.msk.bf16.vlgmr.msra.gmra.mxu0 %vm499_vm1, %v475_v8 }
  0x7d   : > { %1534 = vmatprep.mubr.msk.bf16.mxu1 %vm1965_vm0, %v1964_v0  ;;  %1528 = vmatprep.mubr.msk.bf16.mxu0 %vm1965_vm0, %v1964_v0 }
 0x13c   : > { %v604_v11 = vpop.f32.mrf.mxu1  ;;  %v537_v13 = vpop.f32.mrf.mxu0 }
 0x13d   : > { %v605_v12 = vadd.f32 %v1457_v9, %v604_v11  ;;  %v538_v15 = vadd.f32 %v1453_v10, %v537_v13 }
 0x13e   : > { %v1524_v14 = vpop.f32.mrf.mxu1  ;;  %v1516_v17 = vpop.f32.mrf.mxu0 }
 0x13f   : > { %v2221_v16 = vpack.c.bf16 %v605_v12, %v605_v12  ;;  %v2223_v19 = vpack.c.bf16 %v538_v15, %v538_v15 }
 0x140   : > { %v607_v18 = vpop.f32.mrf.mxu1  ;;  %v540_v21 = vpop.f32.mrf.mxu0 }
 0x141   : > { %726 = vrot.lane.b32.xlu0 %v2221_v16, %s1966_s10  ;;  %v617_v20 = vsel %vm612_vm2, %v2221_v16, 0 }
 0x142   : > { %v1525_v22 = vpop.f32.mrf.mxu1  ;;  %1527 = vmatpush3.bf16.xpose.msra.mxu0 %v617_v20  ;;  %v1517_v23 = vpop.f32.mrf.mxu0 }
 0x143   : > { %1538 = vmatprep.subr.bf16.mxu0 %v1964_v0 }
 0x145   : > { %724 = vrot.lane.b32.xlu0 %v2223_v19, %s1966_s10 }
 0x149   : > { %1529 = vmatmul.mubr.msk.bf16.vlgmr.msra.gmra.mxu0 %vm612_vm2, %v2223_v19 }
 0x14a   : > { %1540 = vmatprep.mubr.msk.bf16.mxu0 %vm1965_vm0, %v1964_v0 }
 0x1b3   : > { %v727_v24 = vpop.permute.xlu0 %726 }
 0x1b4   : > { %v732_v25 = vsel %vm612_vm2, %v727_v24, 0 }
 0x1b5   : > { %1539 = vmatpush3.bf16.xpose.msra.mxu0 %v732_v25 }
 0x1b6   : > { %1550 = vmatprep.subr.bf16.mxu0 %v1964_v0 }
 0x1b7   : > { %v725_v26 = vpop.permute.xlu0 %724 }
 0x1bc   : > { %1541 = vmatmul.mubr.msk.bf16.vlgmr.msra.gmra.mxu0 %vm612_vm2, %v725_v26 }
 0x1bd   : > { %1552 = vmatprep.mubr.msk.bf16.mxu0 %vm1965_vm0, %v1964_v0  ;;  %1551 = vmatpush3.bf16.msra.mxu0 %v841_v54 }
 0x1be   : > { %1562 = vmatprep.subr.bf16.mxu0 %v1964_v0 }
 0x209   : > { %v653_v27 = vpop.f32.mrf.mxu0 }
 0x20a   : > { %v659_v28 = vsel %vm612_vm2, %v653_v27, -inf }
 0x20b   : > { %660 = vmax.xlane.f32.xlu1 %v659_v28  ;;  %v1530_v29 = vpop.f32.mrf.mxu0 }
 0x20d   : > { %v656_v30 = vpop.f32.mrf.mxu0 }
 0x20f   : > { %v1531_v31 = vpop.f32.mrf.mxu0 }
 0x27c   : > { %v768_v32 = vpop.f32.mrf.mxu0 }
 0x27d   : > { %v774_v33 = vsel %vm612_vm2, %v768_v32, -inf }
 0x27e   : > { %775 = vmax.xlane.f32.xlu1 %v774_v33  ;;  %v1542_v34 = vpop.f32.mrf.mxu0 }
 0x280   : > { %v771_v35 = vpop.f32.mrf.mxu0 }
 0x282   : > { %v1543_v36 = vpop.f32.mrf.mxu0 }
 0x28f   : > { %672 = vrot.lane.b32.xlu1 %v2221_v16, %s1967_s13 }
 0x294   : > { %v661_v37 = vpop.xlane.xlu1 %660 }
 0x295   : > { %v662_v38 = vsub.f32 %v653_v27, %v661_v37 }
 0x297   : > { %v663_v39 = vmul.f32 1.442695, %v662_v38 }
 0x299   : > { %1711 = vpow2.f32 %v663_v39 }
 0x2a6   : > { %v1712_v40 = vpop.eup %1711 }
 0x2a7   : > { %v665_v41 = vsel %vm612_vm2, %v1712_v40, 0.0 }
 0x2a8   : > { %666 = vadd.xlane.f32.xlu0 %v665_v41 }
 0x307   : > { %v776_v42 = vpop.xlane.xlu1 %775 }
 0x308   : > { %v777_v43 = vsub.f32 %v768_v32, %v776_v42  ;;  %v1041_v42 = vld [vmem:[#allocation10 + $0x8] sm:$0xf] }
 0x30a   : > { %v778_v44 = vmul.f32 1.442695, %v777_v43  ;;  %v1046_v43 = vsel %vm677_vm3, %v1041_v42, 0 }
 0x30b   : > { %v673_v45 = vpop.permute.xlu1 %672 }
 0x30c   : > { %1713 = vpow2.f32 %v778_v44  ;;  %v679_v46 = vsel %vm677_vm3, %v673_v45, 0 }
 0x30d   : > { %1533 = vmatpush3.bf16.msra.mxu1 %v679_v46 }
 0x30e   : > { %1544 = vmatprep.subr.bf16.mxu1 %v1964_v0 }
 0x319   : > { %v1714_v47 = vpop.eup %1713 }
 0x31a   : > { %v780_v48 = vsel %vm612_vm2, %v1714_v47, 0.0 }
 0x31b   : > { %781 = vadd.xlane.f32.xlu1 %v780_v48 }
 0x32c   : > { %786 = vrot.lane.b32.xlu1 %v2221_v16, %s1968_s29  ;;  %s2400_s29 = sld [smem:[#allocation24_spill]] }
 0x330   : > { %931 = vrot.lane.b32.xlu1 %v2221_v16, %s1969_s12 }
 0x331   : > { %v667_v49 = vpop.xlane.xlu0 %666 }
 0x332   : > { %1715 = vrcp.f32 %v667_v49 }
 0x334   : > { %929 = vrot.lane.b32.xlu1 %v2223_v19, %s1969_s12  ;;  %s1302_s12 = scalar_lea.hbm %s2400_s29, %s1477_s21 }
 0x33f   : > { %v1716_v50 = vpop.eup %1715 }
 0x340   : > { %v669_v51 = vmul.f32 %v1716_v50, %v1712_v40 }
 0x342   : > { %v670_v52 = vpack.c.bf16 %v669_v51, %v669_v51 }
 0x344   : > { %1535 = vmatmul.mubr.msk.bf16.vlgmr.msra.gmra.mxu1 %vm612_vm2, %v670_v52 }
 0x345   : > { %1546 = vmatprep.mubr.msk.bf16.mxu1 %vm1965_vm0, %v1964_v0 }
 0x3a4   : > { %v782_v55 = vpop.xlane.xlu1 %781 }
 0x3a5   : > { %1717 = vrcp.f32 %v782_v55 }
 0x3a8   : > { %v787_v56 = vpop.permute.xlu1 %786 }
 0x3a9   : > { %v792_v57 = vsel %vm677_vm3, %v787_v56, 0 }
 0x3aa   : > { %1545 = vmatpush3.bf16.msra.mxu1 %v792_v57 }
 0x3ab   : > { %1556 = vmatprep.subr.bf16.mxu1 %v1964_v0 }
 0x3ac   : > { %v932_v5 = vpop.permute.xlu1 %931 }
 0x3ad   : > { %v937_v10 = vsel %vm612_vm2, %v932_v5, 0 }
 0x3b0   : > { %v930_v13 = vpop.permute.xlu1 %929 }
 0x3b2   : > { %v1718_v58 = vpop.eup %1717 }
 0x3b3   : > { %v784_v60 = vmul.f32 %v1718_v58, %v1714_v47 }
 0x3b5   : > { %v785_v61 = vpack.c.bf16 %v784_v60, %v784_v60  ;;  %v1201_v60 = vld [vmem:[#allocation10 + $0xc] sm:$0xf] }
 0x3b7   : > { %1547 = vmatmul.mubr.msk.bf16.vlgmr.msra.gmra.mxu1 %vm612_vm2, %v785_v61 }
 0x3b8   : > { %1557 = vmatpush3.bf16.msra.mxu1 %v887_v62  ;;  %1558 = vmatprep.mubr.msk.bf16.mxu1 %vm1965_vm0, %v1964_v0  ;;  %v1206_v62 = vsel %vm677_vm3, %v1201_v60, 0 }
 0x3b9   : > { %1568 = vmatprep.subr.bf16.mxu1 %v1964_v0 }
 0x404   : > { %v715_v63 = vpop.f32.mrf.mxu1 }
 0x405   : > { %v721_v1 = vpack.c.bf16 %v715_v63, %v715_v63 }
 0x406   : > { %v1536_v2 = vpop.f32.mrf.mxu1 }
 0x407   : > { %1559 = vmatmul.mubr.msk.bf16.vlgmr.msra.gmra.mxu1 %vm612_vm2, %v721_v1 }
 0x408   : > { %v718_v3 = vpop.f32.mrf.mxu1  ;;  %1570 = vmatprep.mubr.msk.bf16.mxu1 %vm1965_vm0, %v1964_v0 }
 0x40a   : > { %v1537_v4 = vpop.f32.mrf.mxu1 }
 0x477   : > { %v828_v7 = vpop.f32.mrf.mxu1 }
 0x478   : > { %v834_v8 = vpack.c.bf16 %v828_v7, %v828_v7 }
 0x479   : > { %v1548_v9 = vpop.f32.mrf.mxu1 }
 0x47a   : > { %1553 = vmatmul.mubr.msk.bf16.vlgmr.msra.gmra.mxu0 %vm612_vm2, %v834_v8 }
 0x47b   : > { %1563 = vmatpush3.bf16.xpose.msra.mxu0 %v937_v10  ;;  %v831_v11 = vpop.f32.mrf.mxu1  ;;  %1564 = vmatprep.mubr.msk.bf16.mxu0 %vm1965_vm0, %v1964_v0 }
 0x47c   : > { %1574 = vmatprep.subr.bf16.mxu0 %v1964_v0 }
 0x47d   : > { %v1549_v12 = vpop.f32.mrf.mxu1 }
 0x482   : > { %1565 = vmatmul.mubr.msk.bf16.vlgmr.msra.gmra.mxu0 %vm612_vm2, %v930_v13 }
 0x483   : > { %1576 = vmatprep.mubr.msk.bf16.mxu0 %vm1965_vm0, %v1964_v0  ;;  %1575 = vmatpush3.bf16.msra.mxu0 %v1046_v43 }
 0x484   : > { %1586 = vmatprep.subr.bf16.mxu0 %v1964_v0 }
 0x4c7   : > { %v2272_v14 = vpop.f32.mrf.mxu1 }
 0x4c9   : > { %v1560_v15 = vpop.f32.mrf.mxu1 }
 0x4cb   : > { %v926_v17 = vpop.f32.mrf.mxu1 }
 0x4cd   : > { %v1561_v18 = vpop.f32.mrf.mxu1 }
 0x4ce   : > { %v1473_v18 = vld [vmem:[%s2366_s7] ss:$0 sm:$0xff] }
 0x53a   : > { %v2274_v20 = vpop.f32.mrf.mxu0 }
 0x53c   : > { %v1554_v21 = vpop.f32.mrf.mxu0 }
 0x53e   : > { %v880_v22 = vpop.f32.mrf.mxu0 }
 0x540   : > { %v1555_v23 = vpop.f32.mrf.mxu0 }
 0x542   : > { %v973_v24 = vpop.f32.mrf.mxu0 }
 0x543   : > { %v979_v25 = vsel %vm612_vm2, %v973_v24, -inf }
 0x544   : > { %980 = vmax.xlane.f32.xlu0 %v979_v25  ;;  %v1566_v26 = vpop.f32.mrf.mxu0 }
 0x546   : > { %v976_v27 = vpop.f32.mrf.mxu0 }
 0x548   : > { %v1567_v28 = vpop.f32.mrf.mxu0 }
 0x55a   : > { %991 = vrot.lane.b32.xlu0 %v2221_v16, %s1970_s2  ;;  %s1290_s2 = scalar_lea.sflag [#allocation4], %s2170_s4 }
 0x55e   : > { %1091 = vrot.lane.b32.xlu0 %v2221_v16, %s1971_s24 }
 0x562   : > { %1089 = vrot.lane.b32.xlu0 %v2223_v19, %s1971_s24  ;;  %s1863_s24 = scalar_lea.vmem %s1305_s25, 128 }
 0x563   : > { %p1864_p0 = scmp.ne.s32.totalorder %s1305_s25, %s1863_s24 }
 0x565   : > { %p1865_p3 = pnand %p1864_p0, %p2125_p5 }
 0x567   : > { %p1866_p10 = pneg %p1865_p3 }
 0x5cd   : > { %v981_v29 = vpop.xlane.xlu0 %980 }
 0x5ce   : > { %v982_v30 = vsub.f32 %v973_v24, %v981_v29 }
 0x5d0   : > { %v983_v31 = vmul.f32 1.442695, %v982_v30 }
 0x5d1   : > { %v992_v32 = vpop.permute.xlu0 %991 }
 0x5d2   : > { %1719 = vpow2.f32 %v983_v31  ;;  %v997_v33 = vsel %vm677_vm3, %v992_v32, 0 }
 0x5d3   : > { %1569 = vmatpush3.bf16.msra.mxu1 %v997_v33  ;;  %v1474_v33 = vld [vmem:[%s2367_s8] ss:$0 sm:$0xff] }
 0x5d4   : > { %1580 = vmatprep.subr.bf16.mxu1 %v1964_v0 }
 0x5d5   : > { %v1092_v39 = vpop.permute.xlu0 %1091 }
 0x5d6   : > { %v1097_v40 = vsel %vm612_vm2, %v1092_v39, 0 }
 0x5d9   : > { %v1090_v41 = vpop.permute.xlu0 %1089 }
 0x5df   : > { %v1720_v34 = vpop.eup %1719 }
 0x5e0   : > { %v985_v35 = vsel %vm612_vm2, %v1720_v34, 0.0 }
 0x5e1   : > { %986 = vadd.xlane.f32.xlu1 %v985_v35  ;;  %v1475_v35 = vld [vmem:[%s2368_s9] ss:$0 sm:$0xff] }
 0x66a   : > { %v987_v36 = vpop.xlane.xlu1 %986 }
 0x66b   : > { %1721 = vrcp.f32 %v987_v36 }
 0x678   : > { %v1722_v37 = vpop.eup %1721 }
 0x679   : > { %v989_v38 = vmul.f32 %v1722_v37, %v1720_v34 }
 0x67b   : > { %v990_v19 = vpack.c.bf16 %v989_v38, %v989_v38 }
 0x67d   : > { %1571 = vmatmul.mubr.msk.bf16.vlgmr.msra.gmra.mxu1 %vm612_vm2, %v990_v19 }
 0x67e   : > { %1581 = vmatpush3.bf16.xpose.msra.mxu1 %v1097_v40  ;;  %1582 = vmatprep.mubr.msk.bf16.mxu1 %vm1965_vm0, %v1964_v0 }
 0x67f   : > { %1592 = vmatprep.subr.bf16.mxu1 %v1964_v0 }
 0x685   : > { %1583 = vmatmul.mubr.msk.bf16.vlgmr.msra.gmra.mxu1 %vm612_vm2, %v1090_v41 }
 0x686   : > { %1594 = vmatprep.mubr.msk.bf16.mxu1 %vm1965_vm0, %v1964_v0  ;;  %1593 = vmatpush3.bf16.msra.mxu1 %v1206_v62 }
 0x73d   : > { %v1033_v44 = vpop.f32.mrf.mxu1 }
 0x73e   : > { %v1039_v45 = vpack.c.bf16 %v1033_v44, %v1033_v44 }
 0x73f   : > { %v1572_v46 = vpop.f32.mrf.mxu1 }
 0x740   : > { %1577 = vmatmul.mubr.msk.bf16.vlgmr.msra.gmra.mxu0 %vm612_vm2, %v1039_v45 }
 0x741   : > { %v1036_v47 = vpop.f32.mrf.mxu1  ;;  %1588 = vmatprep.mubr.msk.bf16.mxu0 %vm1965_vm0, %v1964_v0  ;;  %v924_v0 = vadd.f32 %v2272_v14, %v2274_v20 }
 0x743   : > { %v1573_v48 = vpop.f32.mrf.mxu1 }
 0x745   : > { %v1133_v49 = vpop.f32.mrf.mxu1 }
 0x746   : > { %v1139_v50 = vsel %vm612_vm2, %v1133_v49, -inf }
 0x747   : > { %1140 = vmax.xlane.f32.xlu0 %v1139_v50  ;;  %v1584_v51 = vpop.f32.mrf.mxu1 }
 0x749   : > { %v1136_v52 = vpop.f32.mrf.mxu1 }
 0x74b   : > { %v1585_v53 = vpop.f32.mrf.mxu1 }
 0x7d0   : > { %v1141_v54 = vpop.xlane.xlu0 %1140 }
 0x7d1   : > { %v1142_v55 = vsub.f32 %v1133_v49, %v1141_v54 }
 0x7d3   : > { %v1143_v56 = vmul.f32 1.442695, %v1142_v55 }
 0x7d5   : > { %1723 = vpow2.f32 %v1143_v56 }
 0x7e2   : > { %v1724_v57 = vpop.eup %1723 }
 0x7e3   : > { %v1145_v58 = vsel %vm612_vm2, %v1724_v57, 0.0 }
 0x7e4   : > { %1146 = vadd.xlane.f32.xlu1 %v1145_v58 }
 0x7f5   : > { %1151 = vrot.lane.b32.xlu1 %v2221_v16, %s1972_s0  ;;  %s1973_s0 = smov [#allocation11]  }
 0x7f6   : > { %s1867_s30 = sshll.u32 %s1973_s0, 4  ;;  %s1868_s30 = int_to_ptr.vmem [resolvable:$false] %s1867_s30 }
 0x7f7   : > { %s1869_s16 = scalar_lea.vmem %s1868_s30, 256  ;;  %p1870_p11 = scmp.lt.s32.totalorder %s1305_s25, %s1868_s30 }
 0x7f8   : > { %p1871_p9 = scmp.lt.s32.totalorder %s1869_s16, %s1863_s24 }
 0x7fa   : > { %p1872_p13 = por %p1871_p9, %p1870_p11 }
 0x7fc   : > { %p1873_p2 = pnand %p1872_p13, %p1866_p10 }
 0x800   : > { %v1082_v59 = vpop.f32.mrf.mxu0 }
 0x801   : > { %v1088_v61 = vadd.f32 %v1082_v59, %v924_v0 }
 0x802   : > { %v1578_v63 = vpop.f32.mrf.mxu0 }
 0x804   : > { %v1085_v1 = vpop.f32.mrf.mxu0 }
 0x806   : > { %v1579_v2 = vpop.f32.mrf.mxu0 }
 0x86d   : > { %v1147_v3 = vpop.xlane.xlu1 %1146 }
 0x86e   : > { %1725 = vrcp.f32 %v1147_v3 }
 0x871   : > { %v1152_v4 = vpop.permute.xlu1 %1151 }
 0x872   : > { %v1157_v5 = vsel %vm677_vm3, %v1152_v4, 0 }
 0x873   : > { %1587 = vmatpush3.bf16.msra.mxu0 %v1157_v5 }
 0x87b   : > { %v1726_v7 = vpop.eup %1725 }
 0x87c   : > { %v1149_v16 = vmul.f32 %v1726_v7, %v1724_v57 }
 0x87e   : > { %v1150_v8 = vpack.c.bf16 %v1149_v16, %v1149_v16 }
 0x880   : > { %1589 = vmatmul.mubr.msk.bf16.vlgmr.msra.gmra.mxu0 %vm612_vm2, %v1150_v8 }
 0x940   : > { %v1193_v9 = vpop.f32.mrf.mxu0 }
 0x941   : > { %v1199_v10 = vpack.c.bf16 %v1193_v9, %v1193_v9 }
 0x942   : > { %v1590_v11 = vpop.f32.mrf.mxu0 }
 0x943   : > { %1595 = vmatmul.mubr.msk.bf16.vlgmr.msra.gmra.mxu1 %vm612_vm2, %v1199_v10 }
 0x944   : > { %v1196_v12 = vpop.f32.mrf.mxu0 }
 0x946   : > { %v1591_v13 = vpop.f32.mrf.mxu0 }
 0xa03   : > { %v1242_v14 = vpop.f32.mrf.mxu1 }
 0xa04   : > { %v1248_v15 = vadd.f32 %v1242_v14, %v1088_v61 }
 0xa05   : > { %v1596_v17 = vpop.f32.mrf.mxu1 }
 0xa06   : > { %v1249_v20 = vadd.f32 %v1248_v15, %v2203_v6 }
 0xa07   : > { %v1245_v21 = vpop.f32.mrf.mxu1 }
 0xa08   : > { %v1257_v22 = vadd.f32 %v1473_v18, %v1249_v20 }
 0xa09   : > { %v1597_v23 = vpop.f32.mrf.mxu1 }
 0xa0a   : > { %v1258_v24 = vsel %vm499_vm1, %v1257_v22, 0.0 }
 0xa0b   : > { %1259 = vadd.xlane.f32.xlu1 %v1258_v24 }
 0xa94   : > { %v1260_v25 = vpop.xlane.xlu1 %1259 }
 0xa95   : > { %v1262_v26 = vmul.f32 0.03125, %v1260_v25 }
 0xa97   : > { %v1263_v27 = vsub.f32 %v1257_v22, %v1262_v26 }
 0xa99   : > { %v1264_v28 = vmul.f32 %v1263_v27, %v1263_v27 }
 0xa9b   : > { %v1265_v29 = vsel %vm499_vm1, %v1264_v28, 0.0 }
 0xa9c   : > { %1266 = vadd.xlane.f32.xlu0 %v1265_v29 }
 0xb25   : > { %v1267_v30 = vpop.xlane.xlu0 %1266 }
 0xb26   : > { %v1268_v31 = vmul.f32 0.03125, %v1267_v30 }
 0xb28   : > { %v1269_v32 = vadd.f32 1e-05, %v1268_v31 }
 0xb2a   : > { %1727 = vrsqrt.f32 %v1269_v32 }
 0xb37   : > { %v1728_v6 = vpop.eup %1727 }
 0xb38   : > { %v1271_v34 = vmul.f32 %v1728_v6, %v1263_v27 }
 0xb3a   : > { %v1279_v36 = vmul.f32 %v1474_v33, %v1271_v34 }
 0xb3c   : > { %v1287_v37 = vadd.f32 %v1475_v35, %v1279_v36 }
 0xb3e   : > { %1288 = vst.msk [vmem:[%s471_s22] sm:$0xff] %vm499_vm1, %v1287_v37 }
 0xb3f   : > { %1876 = shalt.err (!%p1873_p2)
}
 0xb40   : > { %s1877_s28 = scalar_lea.hbm %s1302_s12, 128  ;;  %s1881_s6 = scalar_lea.hbm %s2400_s29, 256 }
 0xb41   : > { %p1878_p4 = scmp.ne.s32.totalorder %s1302_s12, %s1877_s28  ;;  %p1882_p7 = scmp.lt.s32.totalorder %s1302_s12, %s2400_s29 }
 0xb42   : > { %p1883_p6 = scmp.lt.s32.totalorder %s1881_s6, %s1877_s28 }
 0xb43   : > { %p1879_p1 = pnand %p1878_p4, %p2125_p5 }
 0xb44   : > { %p1884_p12 = por %p1883_p6, %p1882_p7 }
 0xb45   : > { %p1880_p8 = pneg %p1879_p1 }
 0xb47   : > { %p1885_p0 = pnand %p1884_p12, %p1880_p8 }
 0xb49   : > { %1888 = shalt.err (!%p1885_p0)
}
 0xb4a   : > { %1614 = dma.vmem_to_hbm [thread:$0]  (%p2125_p5), %s1305_s25, 128, %s1302_s12, %s1290_s2  }
 0xb4b PF: > { %s2401_s19 = sld [smem:[#allocation17_spill]]  ;;  %p2404_p10 = scmp.ge.s32.totalorder %s1955_s18, 2 }
 0xb4c   : > { %s2402_s21 = sld [smem:[#allocation18_spill]] }
 0xb51   : > { %s1316_s22 = sand.u32 1, %s2401_s19  }
 0xb52   : > { %p2403_p3 = scmp.ne.s32.totalorder %s2402_s21, 0  ;;  %s1317_s10 = scalar_lea.sflag [#allocation4], %s1316_s22 }
 0xb54   : > { %p1634_p11 = pnand %p2404_p10, %p2403_p3 }
 0xb56   : > { %p1635_p9 = pneg %p1634_p11 }
 0xb58   : > { %1930 = dma.done.wait (%p1635_p9), %s1317_s10, 128  }
 0xb59   : > { %1932 = vsyncadd (%p1635_p9), %s1317_s10, 4294967168  ;;  %s30_s18 = sadd.s32 1, %s1955_s18   ;;  %s2405_s26 = sld [smem:[#allocation19_spill]] }
 0xb5a   : > { %p27_p13 = scmp.ge.s32.totalorder %s30_s18, 4   ;;  %s2406_s13 = smov %s1939_s14 }
 0xb5b   : > { %s2407_s14 = smov %s1943_s15  ;;  %s2408_s15 = smov %s2137_s20 }
 0xb5c   : > { %s2409_s16 = smov %s1951_s17  ;;  %29 = sbr.rel (!%p27_p13) target bundleno = 15 (0xf), region = 133 }
 0xb5f   : > { %s2410_s17 = smov %s2405_s26 }
 0xb61   :  { %1322 = vsyncpa [#allocation3], 1 }
 0xb62   :  { %1324 = vsyncpa [#allocation3 + $0x1], 1 }
 0xb63   :  { %1325 = vsyncpa [#allocation6], 1 }
 0xb64   :  { %1327 = vsyncpa [#allocation6 + $0x1], 1 }
 0xb65   :  { %1328 = vsyncpa [#allocation9], 1 }
 0xb66   :  { %1329 = vsyncpa [#allocation4], 1 }
 0xb67   :  { %1331 = vsyncpa [#allocation4 + $0x1], 1 }

</bundles_post_ra>
